<compile_context>
chip_gen: v6e
topology: v6e:2x2x1
jax: 0.10.0
libtpu: 0.0.40
codegen_flags: <defaults>
</compile_context>

<pallas_src>
import functools
import math

import jax
import jax.numpy as jnp
from jax import lax
from jax.experimental import pallas as pl
from jax.experimental.pallas import tpu as pltpu

PAD_ID = 0
_VMEM_LIMIT = 64 * 1024 * 1024


def _cdiv(a, b):
    return (a + b - 1) // b


def _round_up(a, b):
    return _cdiv(a, b) * b


# ---------------------------------------------------------------------------
# Tiled linear kernel: y = act(x @ W + b).  bf16 MXU inputs, f32 accumulate.
# Used for the hoisted input-side GRU matmuls, ctx2dec and the dec_wic fold.
# ---------------------------------------------------------------------------
def _linear_kernel(x_ref, w_ref, b_ref, o_ref, *, activation):
    x = x_ref[...].astype(jnp.bfloat16)
    y = jnp.dot(x, w_ref[...], preferred_element_type=jnp.float32) + b_ref[...]
    if activation == "tanh":
        y = jnp.tanh(y)
    o_ref[...] = y.astype(o_ref.dtype)


def linear(x, w, b, activation=None, max_rows=1024, out_dtype=jnp.float32):
    N, K = x.shape
    M = w.shape[1]
    w = w.astype(jnp.bfloat16)          # pre-cast once; kernel never re-casts W
    b = b.astype(jnp.float32)
    nI = _cdiv(N, max_rows)
    tm = _round_up(_cdiv(N, nI), 8)
    Np = tm * nI
    if Np != N:
        x = jnp.pad(x, ((0, Np - N), (0, 0)))
    out = pl.pallas_call(
        functools.partial(_linear_kernel, activation=activation),
        out_shape=jax.ShapeDtypeStruct((Np, M), out_dtype),
        grid_spec=pltpu.PrefetchScalarGridSpec(
            num_scalar_prefetch=0,
            grid=(nI,),
            in_specs=[
                pl.BlockSpec((tm, K), lambda i: (i, 0)),
                pl.BlockSpec((K, M), lambda i: (0, 0)),
                pl.BlockSpec((1, M), lambda i: (0, 0)),
            ],
            out_specs=pl.BlockSpec((tm, M), lambda i: (i, 0)),
        ),
        compiler_params=pltpu.CompilerParams(
            dimension_semantics=("parallel",),
            vmem_limit_bytes=_VMEM_LIMIT),
    )(x, w, b)
    return out[:N]


# ---------------------------------------------------------------------------
# Bidirectional GRU encoder.  grid = (2 directions, n_time_chunks).
# Directions are "parallel" (megacore-shardable); the time-chunk axis is
# "arbitrary" with the hidden state carried in VMEM scratch, so only one
# Tc-step slice of gi / hs is resident (double-buffered) at a time.
# Direction 1 walks chunks and in-chunk steps in reverse, reproducing
# packed-sequence backward semantics via the (t < len) mask.
# gi = x @ Wih + bih was hoisted outside; each step only does h @ Whh (bf16).
# ---------------------------------------------------------------------------
def _enc_gru_kernel(gi_ref, lens_ref, whh_ref, bhh_ref, hs_ref, hT_ref, h_scr):
    d = pl.program_id(0)              # 0 = forward in time, 1 = backward
    c = pl.program_id(1)              # time-chunk grid index
    nc = pl.num_programs(1)
    Tc = gi_ref.shape[0]
    H = whh_ref.shape[0]

    @pl.when(c == 0)
    def _():
        h_scr[...] = jnp.zeros_like(h_scr)

    lens = lens_ref[...]              # [B, 1] int32
    bhh = bhh_ref[...]                # [1, 3H] f32
    cc = c + d * (nc - 1 - 2 * c)     # actual chunk index (reversed for d=1)
    base = cc * Tc

    def step(s, carry):
        tl = s + d * (Tc - 1 - 2 * s)                    # local index in chunk
        t = base + tl                                    # global timestep
        gi = gi_ref[tl]                                  # [B, 3H] (bih included)
        h = h_scr[...]                                   # [B, H] f32
        gh = jnp.dot(h.astype(jnp.bfloat16), whh_ref[...],
                     preferred_element_type=jnp.float32) + bhh
        r = jax.nn.sigmoid(gi[:, 0:H] + gh[:, 0:H])
        z = jax.nn.sigmoid(gi[:, H:2 * H] + gh[:, H:2 * H])
        n = jnp.tanh(gi[:, 2 * H:3 * H] + r * gh[:, 2 * H:3 * H])
        h_new = (1.0 - z) * n + z * h
        m = (t < lens).astype(jnp.float32)               # packed-seq validity
        h_upd = m * h_new + (1.0 - m) * h                # carry unchanged on pads
        h_scr[...] = h_upd
        hs_ref[tl] = m * h_upd                           # pad positions -> 0
        return carry

    lax.fori_loop(0, Tc, step, 0)
    hT_ref[...] = h_scr[...]          # last valid hidden (len-1 fwd / pos 0 bwd)


def enc_bigru(gi_stack, lens2d, whh_stack_bf, bhh_stack, Tc):
    _, Tp, B, G = gi_stack.shape      # G = 3H, Tp = padded time
    H = whh_stack_bf.shape[1]
    nc = Tp // Tc
    return pl.pallas_call(
        _enc_gru_kernel,
        out_shape=(jax.ShapeDtypeStruct((2, Tp, B, H), jnp.float32),
                   jax.ShapeDtypeStruct((2, B, H), jnp.float32)),
        grid_spec=pltpu.PrefetchScalarGridSpec(
            num_scalar_prefetch=0,
            grid=(2, nc),
            in_specs=[
                pl.BlockSpec((None, Tc, B, G),
                             lambda d, c: (d, c + d * (nc - 1 - 2 * c), 0, 0)),
                pl.BlockSpec((B, 1), lambda d, c: (0, 0)),
                pl.BlockSpec((None, H, G), lambda d, c: (d, 0, 0)),
                pl.BlockSpec((None, 1, G), lambda d, c: (d, 0, 0)),
            ],
            out_specs=[
                pl.BlockSpec((None, Tc, B, H),
                             lambda d, c: (d, c + d * (nc - 1 - 2 * c), 0, 0)),
                pl.BlockSpec((None, B, H), lambda d, c: (d, 0, 0)),
            ],
            scratch_shapes=[pltpu.VMEM((B, H), jnp.float32)],
        ),
        compiler_params=pltpu.CompilerParams(
            dimension_semantics=("parallel", "arbitrary"),
            vmem_limit_bytes=_VMEM_LIMIT),
    )(gi_stack, lens2d, whh_stack_bf, bhh_stack)


# ---------------------------------------------------------------------------
# Attention GRU decoder recurrence (teacher forcing).  Single invocation, full
# time loop in-kernel; emits all hidden states [Td,B,H].  The input-side
# matmul (e@Wie + bih) was hoisted; the ctx@Wic matmul is folded into the
# encoder states (hids_wic), so the per-step MXU work is only the [B,S] score
# matvec, [B,3H] context-gate contraction and h@Whh — all bf16.
# TODO(synk): on v7x, additionally split the batch across a 2-wide "parallel"
# grid (per-core h scratch) to use both TensorCores for the recurrence.
# ---------------------------------------------------------------------------
def _dec_recurrence_kernel(gie_ref, hids_ref, hwic_ref, amask_ref, h0_ref,
                           whh_ref, bhh_ref, hall_ref, h_scr):
    Td = gie_ref.shape[0]
    H = whh_ref.shape[0]
    B = h0_ref.shape[0]

    h_scr[...] = h0_ref[...]

    def step(t, carry):
        h = h_scr[...]                                            # [B, H] f32
        h_bf = h.astype(jnp.bfloat16)
        # ---- dot-product attention over encoder states (bf16 MXU) ----
        sc = jnp.einsum('bqh,bsh->bqs', h_bf[:, None, :], hids_ref[...],
                        preferred_element_type=jnp.float32) + amask_ref[...]
        sc = sc - jnp.max(sc, axis=-1, keepdims=True)
        w = jnp.exp(sc)
        attn = (w * pl.reciprocal(jnp.sum(w, axis=-1, keepdims=True),
                                  approx=True)).astype(jnp.bfloat16)  # [B,1,S]
        # ---- GRU cell; ctx@Wic folded: attn @ (hids @ Wic) ----
        gi = gie_ref[t] + jnp.einsum('bqs,bsg->bqg', attn, hwic_ref[...],
                                     preferred_element_type=jnp.float32
                                     ).reshape(B, 3 * H)
        gh = jnp.dot(h_bf, whh_ref[...],
                     preferred_element_type=jnp.float32) + bhh_ref[...]
        r = jax.nn.sigmoid(gi[:, 0:H] + gh[:, 0:H])
        z = jax.nn.sigmoid(gi[:, H:2 * H] + gh[:, H:2 * H])
        n = jnp.tanh(gi[:, 2 * H:3 * H] + r * gh[:, 2 * H:3 * H])
        h_new = (1.0 - z) * n + z * h
        h_scr[...] = h_new
        hall_ref[t] = h_new
        return carry

    lax.fori_loop(0, Td, step, 0)


def dec_recurrence(gie_tm, hids_bf, hwic_bf, amask, init_h, whh_bf, bhh):
    Td, B, _ = gie_tm.shape
    H = init_h.shape[1]
    return pl.pallas_call(
        _dec_recurrence_kernel,
        out_shape=jax.ShapeDtypeStruct((Td, B, H), jnp.float32),
        scratch_shapes=[pltpu.VMEM((B, H), jnp.float32)],
        compiler_params=pltpu.CompilerParams(vmem_limit_bytes=_VMEM_LIMIT),
    )(gie_tm, hids_bf, hwic_bf, amask, init_h, whh_bf, bhh)


# ---------------------------------------------------------------------------
# Streaming vocab projection + temperature cross-entropy.
# Grid: (row tiles of Td*B, V tiles).  Rows are "parallel" (megacore), V is
# the "arbitrary" reduction axis; out_w (bf16) streams tile-by-tile through
# VMEM (double-buffered by BlockSpec), and the online logsumexp / picked-logit
# state lives in scratch.  Logits are never written to HBM.
# ---------------------------------------------------------------------------
def _ce_kernel(h_ref, tgt_ref, w_ref, b_ref, loss_ref,
               m_scr, l_scr, p_scr, *, inv_temp):
    j = pl.program_id(1)
    nj = pl.num_programs(1)
    tv = w_ref.shape[1]

    @pl.when(j == 0)
    def _():
        m_scr[...] = jnp.full_like(m_scr, -jnp.inf)
        l_scr[...] = jnp.zeros_like(l_scr)
        p_scr[...] = jnp.zeros_like(p_scr)

    logits = (jnp.dot(h_ref[...], w_ref[...],
                      preferred_element_type=jnp.float32) + b_ref[...]) * inv_temp
    tgt = tgt_ref[...]                                            # [tm, 1] int32
    col = j * tv + lax.broadcasted_iota(jnp.int32, logits.shape, 1)
    p_scr[...] += jnp.sum(jnp.where(col == tgt, logits, 0.0),
                          axis=-1, keepdims=True)
    m_prev = m_scr[...]
    m_new = jnp.maximum(m_prev, jnp.max(logits, axis=-1, keepdims=True))
    l_scr[...] = (l_scr[...] * jnp.exp(m_prev - m_new)
                  + jnp.sum(jnp.exp(logits - m_new), axis=-1, keepdims=True))
    m_scr[...] = m_new

    @pl.when(j == nj - 1)
    def _():
        valid = (tgt != -100).astype(jnp.float32)
        loss_ref[...] = (m_scr[...] + jnp.log(l_scr[...]) - p_scr[...]) * valid


def ce_loss_rows(h_rows_bf, tgt_rows, wout_bf, bout, inv_temp, tm, tv):
    Rp, H = h_rows_bf.shape
    Vp = wout_bf.shape[1]
    nI, nJ = Rp // tm, Vp // tv
    return pl.pallas_call(
        functools.partial(_ce_kernel, inv_temp=inv_temp),
        out_shape=jax.ShapeDtypeStruct((Rp, 1), jnp.float32),
        grid_spec=pltpu.PrefetchScalarGridSpec(
            num_scalar_prefetch=0,
            grid=(nI, nJ),
            in_specs=[
                pl.BlockSpec((tm, H), lambda i, j: (i, 0)),
                pl.BlockSpec((tm, 1), lambda i, j: (i, 0)),
                pl.BlockSpec((H, tv), lambda i, j: (0, j)),
                pl.BlockSpec((1, tv), lambda i, j: (0, j)),
            ],
            out_specs=pl.BlockSpec((tm, 1), lambda i, j: (i, 0)),
            scratch_shapes=[pltpu.VMEM((tm, 1), jnp.float32)] * 3,
        ),
        compiler_params=pltpu.CompilerParams(
            dimension_semantics=("parallel", "arbitrary"),
            vmem_limit_bytes=_VMEM_LIMIT),
    )(h_rows_bf, tgt_rows, wout_bf, bout)


# ---------------------------------------------------------------------------
# Parameter init (deterministic, mirrors module __init__ shapes; n_layers=1)
# ---------------------------------------------------------------------------
def init_params(key, vocab, emb_dim, H):
    ks = jax.random.split(key, 24)
    stdv = 1.0 / math.sqrt(H)
    u = lambda k, shape, a: jax.random.uniform(k, shape, jnp.float32, -a, a)

    def emb_table(k):
        e = jax.random.normal(k, (vocab, emb_dim), jnp.float32)
        return e.at[PAD_ID].set(0.0)      # padding_idx=PAD_ID

    return {
        "desc_emb": emb_table(ks[0]),
        "api_emb": emb_table(ks[1]),
        "enc_f_wih": u(ks[2], (emb_dim, 3 * H), stdv),
        "enc_f_whh": u(ks[3], (H, 3 * H), stdv),
        "enc_f_bih": u(ks[4], (1, 3 * H), stdv),
        "enc_f_bhh": u(ks[5], (1, 3 * H), stdv),
        "enc_b_wih": u(ks[6], (emb_dim, 3 * H), stdv),
        "enc_b_whh": u(ks[7], (H, 3 * H), stdv),
        "enc_b_bih": u(ks[8], (1, 3 * H), stdv),
        "enc_b_bhh": u(ks[9], (1, 3 * H), stdv),
        "ctx2dec_w": u(ks[10], (2 * H, H), 0.08),
        "ctx2dec_b": jnp.zeros((1, H), jnp.float32),
        "dec_wie": u(ks[11], (emb_dim, 3 * H), stdv),
        "dec_wic": u(ks[12], (H, 3 * H), stdv),
        "dec_whh": u(ks[13], (H, 3 * H), stdv),
        "dec_bih": u(ks[14], (1, 3 * H), stdv),
        "dec_bhh": u(ks[15], (1, 3 * H), stdv),
        "out_w": u(ks[16], (H, vocab), stdv),
        "out_b": jnp.zeros((1, vocab), jnp.float32),
    }


# ---------------------------------------------------------------------------
# Full RNNEncDec forward (returns scalar loss)
# ---------------------------------------------------------------------------
def rnn_enc_dec_forward(params, src_seqs, src_lens, target, tar_lens, temp):
    # TODO(synk): training-mode gaussian encoder noise (noise_radius) and
    # decoder dropout are omitted (eval semantics); n_layers fixed to 1.
    B, S = src_seqs.shape
    E = params["desc_emb"].shape[1]
    H = params["ctx2dec_w"].shape[1]

    # ---- encoder: hoist x @ Wih for BOTH directions into one big matmul ----
    x = params["desc_emb"][src_seqs]                              # [B, S, E]
    x_tm = jnp.transpose(x, (1, 0, 2)).reshape(S * B, E)          # time-major
    wih_cat = jnp.concatenate([params["enc_f_wih"], params["enc_b_wih"]], axis=1)
    bih_cat = jnp.concatenate([params["enc_f_bih"], params["enc_b_bih"]], axis=1)
    gi_cat = linear(x_tm, wih_cat, bih_cat).reshape(S, B, 6 * H)
    gi_stack = jnp.stack([gi_cat[..., :3 * H], gi_cat[..., 3 * H:]], axis=0)

    # time chunking (bounds VMEM to O(Tc*B*4H); minimal padding)
    max_chunk = 32
    nchunks = _cdiv(S, max_chunk)
    Tc = _cdiv(S, nchunks)
    Sp = Tc * nchunks
    if Sp != S:
        gi_stack = jnp.pad(gi_stack, ((0, 0), (0, Sp - S), (0, 0), (0, 0)))

    whh_stack = jnp.stack([params["enc_f_whh"], params["enc_b_whh"]],
                          axis=0).astype(jnp.bfloat16)
    bhh_stack = jnp.stack([params["enc_f_bhh"], params["enc_b_bhh"]], axis=0)
    lens2d = src_lens.reshape(B, 1).astype(jnp.int32)

    hs, hT = enc_bigru(gi_stack, lens2d, whh_stack, bhh_stack, Tc)
    hs = hs[:, :S]                                                # [2, S, B, H]

    c = jnp.concatenate([hT[0], hT[1]], axis=-1)                  # [B, 2H]
    hids_2h = jnp.transpose(jnp.concatenate([hs[0], hs[1]], axis=-1),
                            (1, 0, 2))                            # [B, S, 2H]

    # ---- ctx2dec on summary + per-step states in ONE fused projection ----
    rows = jnp.concatenate([c[:, None, :], hids_2h], axis=1)      # [B, S+1, 2H]
    proj = linear(rows.reshape(B * (S + 1), 2 * H),
                  params["ctx2dec_w"], params["ctx2dec_b"],
                  activation="tanh").reshape(B, S + 1, H)
    init_h = proj[:, 0]                                           # [B, H]
    hids_p = proj[:, 1:]                                          # [B, S, H]

    # attention-side tensors in bf16; dec_wic folded into the encoder states
    hids_bf = hids_p.astype(jnp.bfloat16)                         # [B, S, H]
    hwic_bf = linear(hids_p.reshape(B * S, H), params["dec_wic"],
                     jnp.zeros((1, 3 * H), jnp.float32),
                     out_dtype=jnp.bfloat16).reshape(B, S, 3 * H)

    amask = jnp.where(src_seqs == PAD_ID, -1e9, 0.0
                      ).astype(jnp.float32)[:, None, :]           # [B, 1, S]

    # ---- decoder recurrence: hoist e @ Wie, emit all hidden states ----
    dec_in = target[:, :-1]
    Td = dec_in.shape[1]
    emb = params["api_emb"][dec_in]                               # [B, Td, E]
    emb_tm = jnp.transpose(emb, (1, 0, 2)).reshape(Td * B, E)
    gie = linear(emb_tm, params["dec_wie"], params["dec_bih"]).reshape(Td, B, 3 * H)

    h_all = dec_recurrence(gie, hids_bf, hwic_bf, amask, init_h,
                           params["dec_whh"].astype(jnp.bfloat16),
                           params["dec_bhh"])                     # [Td, B, H]

    # ---- streaming vocab projection + temperature CE (ignore_index=-100) ----
    dec_target = target[:, 1:]
    dec_target = jnp.where(dec_target == PAD_ID, -100, dec_target).astype(jnp.int32)
    tgt_rows = jnp.transpose(dec_target, (1, 0)).reshape(Td * B, 1)

    V = params["out_w"].shape[1]
    R = Td * B
    nI = _cdiv(R, 256)
    tm = _round_up(_cdiv(R, nI), 8)
    Rp = tm * nI
    max_tv = 2048
    if V <= max_tv:
        nJ, tv, Vp = 1, V, V
    else:
        nJ = _cdiv(V, max_tv)
        tv = _round_up(_cdiv(V, nJ), 128)
        Vp = tv * nJ

    h_rows = h_all.reshape(R, H).astype(jnp.bfloat16)
    if Rp != R:
        h_rows = jnp.pad(h_rows, ((0, Rp - R), (0, 0)))
        tgt_rows = jnp.pad(tgt_rows, ((0, Rp - R), (0, 0)), constant_values=-100)
    wout_bf = params["out_w"].astype(jnp.bfloat16)
    bout = params["out_b"]
    if Vp != V:
        wout_bf = jnp.pad(wout_bf, ((0, 0), (0, Vp - V)))
        bout = jnp.pad(bout, ((0, 0), (0, Vp - V)), constant_values=-1e9)

    per_row = ce_loss_rows(h_rows, tgt_rows, wout_bf, bout,
                           1.0 / float(temp), tm, tv)             # [Rp, 1]

    cnt = jnp.sum((dec_target != -100).astype(jnp.float32))
    return jnp.sum(per_row) / jnp.maximum(cnt, 1.0)


# ---------------------------------------------------------------------------
if __name__ == "__main__":
    # small config consistent with the module
    config = dict(vocab_size=64, emb_dim=32, n_hidden=32, max_sent_len=8,
                  temp=0.8, n_layers=1, noise_radius=0.0, attention=True,
                  dropout=0.0)
    B, S, L = 2, 8, 8

    key = jax.random.PRNGKey(0)
    k_par, k_src, k_tgt = jax.random.split(key, 3)

    params = init_params(k_par, config["vocab_size"], config["emb_dim"],
                         config["n_hidden"])

    src_lens = jnp.array([8, 6], jnp.int32)
    tar_lens = jnp.array([8, 7], jnp.int32)
    src_seqs = jax.random.randint(k_src, (B, S), 1, config["vocab_size"])
    src_seqs = jnp.where(jnp.arange(S)[None, :] < src_lens[:, None],
                         src_seqs, PAD_ID).astype(jnp.int32)
    target = jax.random.randint(k_tgt, (B, L), 1, config["vocab_size"])
    target = jnp.where(jnp.arange(L)[None, :] < tar_lens[:, None],
                       target, PAD_ID).astype(jnp.int32)

    fwd = jax.jit(rnn_enc_dec_forward, static_argnums=(5,))
    loss = fwd(params, src_seqs, src_lens, target, tar_lens, config["temp"])
    loss = jax.block_until_ready(loss)
    assert jnp.isfinite(loss), f"non-finite loss: {loss}"
    print("KERNEL_OK")
</pallas_src>

<mosaic_0001>
module attributes {stable_mosaic.version = 11 : i64} {
  func.func @_linear_kernel(%arg0: i32, %arg1: memref<16x32xf32, #tpu.memory_space<vmem>>, %arg2: memref<32x192xbf16, #tpu.memory_space<vmem>>, %arg3: memref<1x192xf32, #tpu.memory_space<vmem>>, %arg4: memref<16x192xf32, #tpu.memory_space<vmem>>) attributes {dimension_semantics = [#tpu.dimension_semantics<parallel>], iteration_bounds = array<i64: 1>, scalar_prefetch = 0 : i64, scratch_operands = 0 : i64, tpu.core_type = #tpu.core_type<tc>, window_params = [{transform_indices = @transform_0, window_bounds = array<i64: 16, 32>}, {pipeline_mode = #tpu.pipeline_mode<synchronous>, transform_indices = @transform_1, window_bounds = array<i64: 32, 192>}, {pipeline_mode = #tpu.pipeline_mode<synchronous>, transform_indices = @transform_2, window_bounds = array<i64: 1, 192>}, {transform_indices = @transform_3, window_bounds = array<i64: 16, 192>}]} {
    %c0 = arith.constant 0 : index
    %c0_0 = arith.constant 0 : index
    %0 = vector.load %arg1[%c0, %c0_0] : memref<16x32xf32, #tpu.memory_space<vmem>>, vector<16x32xf32>
    %1 = arith.truncf %0 : vector<16x32xf32> to vector<16x32xbf16>
    %c0_1 = arith.constant 0 : index
    %c0_2 = arith.constant 0 : index
    %2 = vector.load %arg2[%c0_1, %c0_2] : memref<32x192xbf16, #tpu.memory_space<vmem>>, vector<32x192xbf16>
    %cst = arith.constant dense<0.000000e+00> : vector<16x192xf32>
    %3 = tpu.matmul %1, %2, %cst {dimension_numbers = #tpu.dot_dimension_numbers<[1], [0], [0], [1], [0, 0, 1, 1], [], []>} : vector<16x32xbf16>, vector<32x192xbf16>, vector<16x192xf32> -> vector<16x192xf32>
    %c0_3 = arith.constant 0 : index
    %c0_4 = arith.constant 0 : index
    %4 = vector.load %arg3[%c0_3, %c0_4] : memref<1x192xf32, #tpu.memory_space<vmem>>, vector<1x192xf32>
    %5 = vector.broadcast %4 : vector<1x192xf32> to vector<16x192xf32>
    %6 = arith.addf %3, %5 : vector<16x192xf32>
    %c0_5 = arith.constant 0 : index
    %c0_6 = arith.constant 0 : index
    %7 = vector.load %arg4[%c0_5, %c0_6] : memref<16x192xf32, #tpu.memory_space<vmem>>, vector<16x192xf32>
    tpu.vector_store %arg4[%c0_5, %c0_6], %6 {strides = array<i32>} : memref<16x192xf32, #tpu.memory_space<vmem>>, vector<16x192xf32>,
    return
  }
  func.func @transform_0(%arg0: i32) -> (i32, i32) {
    %c0_i32 = arith.constant 0 : i32
    %c0_i32_0 = arith.constant 0 : i32
    return %arg0, %c0_i32 : i32, i32
  }
  func.func @transform_1(%arg0: i32) -> (i32, i32) {
    %c0_i32 = arith.constant 0 : i32
    %c0_i32_0 = arith.constant 0 : i32
    %c0_i32_1 = arith.constant 0 : i32
    return %c0_i32, %c0_i32_0 : i32, i32
  }
  func.func @transform_2(%arg0: i32) -> (i32, i32) {
    %c0_i32 = arith.constant 0 : i32
    %c0_i32_0 = arith.constant 0 : i32
    %c0_i32_1 = arith.constant 0 : i32
    return %c0_i32, %c0_i32_0 : i32, i32
  }
  func.func @transform_3(%arg0: i32) -> (i32, i32) {
    %c0_i32 = arith.constant 0 : i32
    %c0_i32_0 = arith.constant 0 : i32
    return %arg0, %c0_i32 : i32, i32
  }
}

module attributes {stable_mosaic.version = 11 : i64} {
  func.func @_enc_gru_kernel(%arg0: i32, %arg1: i32, %arg2: memref<1x8x2x96xf32, #tpu.memory_space<vmem>>, %arg3: memref<2x1xi32, #tpu.memory_space<vmem>>, %arg4: memref<1x32x96xbf16, #tpu.memory_space<vmem>>, %arg5: memref<1x1x96xf32, #tpu.memory_space<vmem>>, %arg6: memref<1x8x2x32xf32, #tpu.memory_space<vmem>>, %arg7: memref<1x2x32xf32, #tpu.memory_space<vmem>>, %arg8: memref<2x32xf32, #tpu.memory_space<vmem>>) attributes {dimension_semantics = [#tpu.dimension_semantics<parallel>, #tpu.dimension_semantics<arbitrary>], iteration_bounds = array<i64: 2, 1>, scalar_prefetch = 0 : i64, scratch_operands = 1 : i64, tpu.core_type = #tpu.core_type<tc>, window_params = [{transform_indices = @transform_0, window_bounds = array<i64: 1, 8, 2, 96>}, {pipeline_mode = #tpu.pipeline_mode<synchronous>, transform_indices = @transform_1, window_bounds = array<i64: 2, 1>}, {transform_indices = @transform_2, window_bounds = array<i64: 1, 32, 96>}, {transform_indices = @transform_3, window_bounds = array<i64: 1, 1, 96>}, {transform_indices = @transform_4, window_bounds = array<i64: 1, 8, 2, 32>}, {transform_indices = @transform_5, window_bounds = array<i64: 1, 2, 32>}]} {
    %c0_i32 = arith.constant 0 : i32
    %0 = arith.cmpi eq, %arg1, %c0_i32 : i32
    %1 = arith.extui %0 : i1 to i32
    %c0_i32_0 = arith.constant 0 : i32
    %2 = arith.cmpi ne, %1, %c0_i32_0 : i32
    scf.if %2 {
      %cst = arith.constant 0.000000e+00 : f32
      %16 = vector.broadcast %cst : f32 to vector<2x32xf32>
      %c0_14 = arith.constant 0 : index
      %c0_15 = arith.constant 0 : index
      %17 = vector.load %arg8[%c0_14, %c0_15] : memref<2x32xf32, #tpu.memory_space<vmem>>, vector<2x32xf32>
      tpu.vector_store %arg8[%c0_14, %c0_15], %16 {strides = array<i32>} : memref<2x32xf32, #tpu.memory_space<vmem>>, vector<2x32xf32>,
    } else {
    }
    %c0 = arith.constant 0 : index
    %c0_1 = arith.constant 0 : index
    %3 = vector.load %arg3[%c0, %c0_1] : memref<2x1xi32, #tpu.memory_space<vmem>>, vector<2x1xi32>
    %c0_2 = arith.constant 0 : index
    %c0_3 = arith.constant 0 : index
    %c0_4 = arith.constant 0 : index
    %4 = vector.load %arg5[%c0_2, %c0_3, %c0_4] : memref<1x1x96xf32, #tpu.memory_space<vmem>>, vector<1x1x96xf32>
    %5 = vector.shape_cast %4 : vector<1x1x96xf32> to vector<1x96xf32>
    %c2_i32 = arith.constant 2 : i32
    %6 = arith.muli %c2_i32, %arg1 : i32
    %c0_i32_5 = arith.constant 0 : i32
    %7 = arith.subi %c0_i32_5, %6 : i32
    %8 = arith.muli %arg0, %7 : i32
    %9 = arith.addi %arg1, %8 : i32
    %c8_i32 = arith.constant 8 : i32
    %10 = arith.muli %9, %c8_i32 : i32
    %c0_i32_6 = arith.constant 0 : i32
    %c8_i32_7 = arith.constant 8 : i32
    %11 = arith.addi %c0_i32_6, %c8_i32_7 : i32
    %c1_i32 = arith.constant 1 : i32
    scf.for %arg9 = %c0_i32_6 to %11 step %c1_i32  : i32 {
      %c2_i32_14 = arith.constant 2 : i32
      %16 = arith.muli %c2_i32_14, %arg9 : i32
      %c7_i32 = arith.constant 7 : i32
      %17 = arith.subi %c7_i32, %16 : i32
      %18 = arith.muli %arg0, %17 : i32
      %19 = arith.addi %arg9, %18 : i32
      %20 = arith.addi %10, %19 : i32
      %c0_15 = arith.constant 0 : index
      %21 = arith.index_cast %19 : i32 to index
      %c0_16 = arith.constant 0 : index
      %c0_17 = arith.constant 0 : index
      %22 = vector.load %arg2[%c0_15, %21, %c0_16, %c0_17] : memref<1x8x2x96xf32, #tpu.memory_space<vmem>>, vector<1x1x2x96xf32>
      %23 = vector.shape_cast %22 : vector<1x1x2x96xf32> to vector<2x96xf32>
      %c0_18 = arith.constant 0 : index
      %c0_19 = arith.constant 0 : index
      %24 = vector.load %arg8[%c0_18, %c0_19] : memref<2x32xf32, #tpu.memory_space<vmem>>, vector<2x32xf32>
      %25 = arith.truncf %24 : vector<2x32xf32> to vector<2x32xbf16>
      %c0_20 = arith.constant 0 : index
      %c0_21 = arith.constant 0 : index
      %c0_22 = arith.constant 0 : index
      %26 = vector.load %arg4[%c0_20, %c0_21, %c0_22] : memref<1x32x96xbf16, #tpu.memory_space<vmem>>, vector<1x32x96xbf16>
      %27 = vector.shape_cast %26 : vector<1x32x96xbf16> to vector<32x96xbf16>
      %cst = arith.constant dense<0.000000e+00> : vector<2x96xf32>
      %28 = tpu.matmul %25, %27, %cst {dimension_numbers = #tpu.dot_dimension_numbers<[1], [0], [0], [1], [0, 0, 1, 1], [], []>} : vector<2x32xbf16>, vector<32x96xbf16>, vector<2x96xf32> -> vector<2x96xf32>
      %29 = vector.broadcast %5 : vector<1x96xf32> to vector<2x96xf32>
      %30 = arith.addf %28, %29 : vector<2x96xf32>
      %31 = vector.extract_strided_slice %23 {offsets = [0, 0], sizes = [2, 32], strides = [1, 1]} : vector<2x96xf32> to vector<2x32xf32>
      %32 = vector.extract_strided_slice %30 {offsets = [0, 0], sizes = [2, 32], strides = [1, 1]} : vector<2x96xf32> to vector<2x32xf32>
      %33 = arith.addf %31, %32 : vector<2x32xf32>
      %34 = arith.negf %33 : vector<2x32xf32>
      %35 = math.exp %34 : vector<2x32xf32>
      %cst_23 = arith.constant 1.000000e+00 : f32
      %36 = vector.broadcast %cst_23 : f32 to vector<2x32xf32>
      %37 = arith.addf %36, %35 : vector<2x32xf32>
      %38 = arith.divf %36, %37 : vector<2x32xf32>
      %39 = vector.extract_strided_slice %23 {offsets = [0, 32], sizes = [2, 32], strides = [1, 1]} : vector<2x96xf32> to vector<2x32xf32>
      %40 = vector.extract_strided_slice %30 {offsets = [0, 32], sizes = [2, 32], strides = [1, 1]} : vector<2x96xf32> to vector<2x32xf32>
      %41 = arith.addf %39, %40 : vector<2x32xf32>
      %42 = arith.negf %41 : vector<2x32xf32>
      %43 = math.exp %42 : vector<2x32xf32>
      %cst_24 = arith.constant 1.000000e+00 : f32
      %44 = vector.broadcast %cst_24 : f32 to vector<2x32xf32>
      %45 = arith.addf %44, %43 : vector<2x32xf32>
      %46 = arith.divf %44, %45 : vector<2x32xf32>
      %47 = vector.extract_strided_slice %23 {offsets = [0, 64], sizes = [2, 32], strides = [1, 1]} : vector<2x96xf32> to vector<2x32xf32>
      %48 = vector.extract_strided_slice %30 {offsets = [0, 64], sizes = [2, 32], strides = [1, 1]} : vector<2x96xf32> to vector<2x32xf32>
      %49 = arith.mulf %38, %48 : vector<2x32xf32>
      %50 = arith.addf %47, %49 : vector<2x32xf32>
      %51 = math.tanh %50 : vector<2x32xf32>
      %cst_25 = arith.constant 1.000000e+00 : f32
      %52 = vector.broadcast %cst_25 : f32 to vector<2x32xf32>
      %53 = arith.subf %52, %46 : vector<2x32xf32>
      %54 = arith.mulf %53, %51 : vector<2x32xf32>
      %55 = arith.mulf %46, %24 : vector<2x32xf32>
      %56 = arith.addf %54, %55 : vector<2x32xf32>
      %57 = vector.broadcast %20 : i32 to vector<2x1xi32>
      %58 = arith.cmpi slt, %57, %3 : vector<2x1xi32>
      %59 = arith.extui %58 : vector<2x1xi1> to vector<2x1xi32>
      %60 = arith.sitofp %59 : vector<2x1xi32> to vector<2x1xf32>
      %61 = vector.broadcast %60 : vector<2x1xf32> to vector<2x32xf32>
      %62 = arith.mulf %61, %56 : vector<2x32xf32>
      %cst_26 = arith.constant 1.000000e+00 : f32
      %63 = vector.broadcast %cst_26 : f32 to vector<2x1xf32>
      %64 = arith.subf %63, %60 : vector<2x1xf32>
      %65 = vector.broadcast %64 : vector<2x1xf32> to vector<2x32xf32>
      %66 = arith.mulf %65, %24 : vector<2x32xf32>
      %67 = arith.addf %62, %66 : vector<2x32xf32>
      %c0_27 = arith.constant 0 : index
      %c0_28 = arith.constant 0 : index
      %68 = vector.load %arg8[%c0_27, %c0_28] : memref<2x32xf32, #tpu.memory_space<vmem>>, vector<2x32xf32>
      tpu.vector_store %arg8[%c0_27, %c0_28], %67 {strides = array<i32>} : memref<2x32xf32, #tpu.memory_space<vmem>>, vector<2x32xf32>,
      %69 = vector.broadcast %60 : vector<2x1xf32> to vector<2x32xf32>
      %70 = arith.mulf %69, %67 : vector<2x32xf32>
      %c0_29 = arith.constant 0 : index
      %71 = arith.index_cast %19 : i32 to index
      %c0_30 = arith.constant 0 : index
      %c0_31 = arith.constant 0 : index
      %72 = vector.load %arg6[%c0_29, %71, %c0_30, %c0_31] : memref<1x8x2x32xf32, #tpu.memory_space<vmem>>, vector<1x1x2x32xf32>
      %73 = vector.shape_cast %72 : vector<1x1x2x32xf32> to vector<2x32xf32>
      %74 = vector.shape_cast %70 : vector<2x32xf32> to vector<1x1x2x32xf32>
      tpu.vector_store %arg6[%c0_29, %71, %c0_30, %c0_31], %74 {strides = array<i32>} : memref<1x8x2x32xf32, #tpu.memory_space<vmem>>, vector<1x1x2x32xf32>,
    }
    %c8_i32_8 = arith.constant 8 : i32
    %c0_9 = arith.constant 0 : index
    %c0_10 = arith.constant 0 : index
    %12 = vector.load %arg8[%c0_9, %c0_10] : memref<2x32xf32, #tpu.memory_space<vmem>>, vector<2x32xf32>
    %c0_11 = arith.constant 0 : index
    %c0_12 = arith.constant 0 : index
    %c0_13 = arith.constant 0 : index
    %13 = vector.load %arg7[%c0_11, %c0_12, %c0_13] : memref<1x2x32xf32, #tpu.memory_space<vmem>>, vector<1x2x32xf32>
    %14 = vector.shape_cast %13 : vector<1x2x32xf32> to vector<2x32xf32>
    %15 = vector.shape_cast %12 : vector<2x32xf32> to vector<1x2x32xf32>
    tpu.vector_store %arg7[%c0_11, %c0_12, %c0_13], %15 {strides = array<i32>} : memref<1x2x32xf32, #tpu.memory_space<vmem>>, vector<1x2x32xf32>,
    return
  }
  func.func @transform_0(%arg0: i32, %arg1: i32) -> (i32, i32, i32, i32) {
    %c2_i32 = arith.constant 2 : i32
    %0 = arith.muli %c2_i32, %arg1 : i32
    %c0_i32 = arith.constant 0 : i32
    %1 = arith.subi %c0_i32, %0 : i32
    %2 = arith.muli %arg0, %1 : i32
    %3 = arith.addi %arg1, %2 : i32
    %c0_i32_0 = arith.constant 0 : i32
    %c0_i32_1 = arith.constant 0 : i32
    %c0_i32_2 = arith.constant 0 : i32
    return %arg0, %3, %c0_i32_0, %c0_i32_1 : i32, i32, i32, i32
  }
  func.func @transform_1(%arg0: i32, %arg1: i32) -> (i32, i32) {
    %c0_i32 = arith.constant 0 : i32
    %c0_i32_0 = arith.constant 0 : i32
    %c0_i32_1 = arith.constant 0 : i32
    return %c0_i32, %c0_i32_0 : i32, i32
  }
  func.func @transform_2(%arg0: i32, %arg1: i32) -> (i32, i32, i32) {
    %c0_i32 = arith.constant 0 : i32
    %c0_i32_0 = arith.constant 0 : i32
    %c0_i32_1 = arith.constant 0 : i32
    return %arg0, %c0_i32, %c0_i32_0 : i32, i32, i32
  }
  func.func @transform_3(%arg0: i32, %arg1: i32) -> (i32, i32, i32) {
    %c0_i32 = arith.constant 0 : i32
    %c0_i32_0 = arith.constant 0 : i32
    %c0_i32_1 = arith.constant 0 : i32
    return %arg0, %c0_i32, %c0_i32_0 : i32, i32, i32
  }
  func.func @transform_4(%arg0: i32, %arg1: i32) -> (i32, i32, i32, i32) {
    %c2_i32 = arith.constant 2 : i32
    %0 = arith.muli %c2_i32, %arg1 : i32
    %c0_i32 = arith.constant 0 : i32
    %1 = arith.subi %c0_i32, %0 : i32
    %2 = arith.muli %arg0, %1 : i32
    %3 = arith.addi %arg1, %2 : i32
    %c0_i32_0 = arith.constant 0 : i32
    %c0_i32_1 = arith.constant 0 : i32
    %c0_i32_2 = arith.constant 0 : i32
    return %arg0, %3, %c0_i32_0, %c0_i32_1 : i32, i32, i32, i32
  }
  func.func @transform_5(%arg0: i32, %arg1: i32) -> (i32, i32, i32) {
    %c0_i32 = arith.constant 0 : i32
    %c0_i32_0 = arith.constant 0 : i32
    %c0_i32_1 = arith.constant 0 : i32
    return %arg0, %c0_i32, %c0_i32_0 : i32, i32, i32
  }
}

module attributes {stable_mosaic.version = 11 : i64} {
  func.func @_linear_kernel(%arg0: i32, %arg1: memref<24x64xf32, #tpu.memory_space<vmem>>, %arg2: memref<64x32xbf16, #tpu.memory_space<vmem>>, %arg3: memref<1x32xf32, #tpu.memory_space<vmem>>, %arg4: memref<24x32xf32, #tpu.memory_space<vmem>>) attributes {dimension_semantics = [#tpu.dimension_semantics<parallel>], iteration_bounds = array<i64: 1>, scalar_prefetch = 0 : i64, scratch_operands = 0 : i64, tpu.core_type = #tpu.core_type<tc>, window_params = [{transform_indices = @transform_0, window_bounds = array<i64: 24, 64>}, {pipeline_mode = #tpu.pipeline_mode<synchronous>, transform_indices = @transform_1, window_bounds = array<i64: 64, 32>}, {pipeline_mode = #tpu.pipeline_mode<synchronous>, transform_indices = @transform_2, window_bounds = array<i64: 1, 32>}, {transform_indices = @transform_3, window_bounds = array<i64: 24, 32>}]} {
    %c0 = arith.constant 0 : index
    %c0_0 = arith.constant 0 : index
    %0 = vector.load %arg1[%c0, %c0_0] : memref<24x64xf32, #tpu.memory_space<vmem>>, vector<24x64xf32>
    %1 = arith.truncf %0 : vector<24x64xf32> to vector<24x64xbf16>
    %c0_1 = arith.constant 0 : index
    %c0_2 = arith.constant 0 : index
    %2 = vector.load %arg2[%c0_1, %c0_2] : memref<64x32xbf16, #tpu.memory_space<vmem>>, vector<64x32xbf16>
    %cst = arith.constant dense<0.000000e+00> : vector<24x32xf32>
    %3 = tpu.matmul %1, %2, %cst {dimension_numbers = #tpu.dot_dimension_numbers<[1], [0], [0], [1], [0, 0, 1, 1], [], []>} : vector<24x64xbf16>, vector<64x32xbf16>, vector<24x32xf32> -> vector<24x32xf32>
    %c0_3 = arith.constant 0 : index
    %c0_4 = arith.constant 0 : index
    %4 = vector.load %arg3[%c0_3, %c0_4] : memref<1x32xf32, #tpu.memory_space<vmem>>, vector<1x32xf32>
    %5 = vector.broadcast %4 : vector<1x32xf32> to vector<24x32xf32>
    %6 = arith.addf %3, %5 : vector<24x32xf32>
    %7 = math.tanh %6 : vector<24x32xf32>
    %c0_5 = arith.constant 0 : index
    %c0_6 = arith.constant 0 : index
    %8 = vector.load %arg4[%c0_5, %c0_6] : memref<24x32xf32, #tpu.memory_space<vmem>>, vector<24x32xf32>
    tpu.vector_store %arg4[%c0_5, %c0_6], %7 {strides = array<i32>} : memref<24x32xf32, #tpu.memory_space<vmem>>, vector<24x32xf32>,
    return
  }
  func.func @transform_0(%arg0: i32) -> (i32, i32) {
    %c0_i32 = arith.constant 0 : i32
    %c0_i32_0 = arith.constant 0 : i32
    return %arg0, %c0_i32 : i32, i32
  }
  func.func @transform_1(%arg0: i32) -> (i32, i32) {
    %c0_i32 = arith.constant 0 : i32
    %c0_i32_0 = arith.constant 0 : i32
    %c0_i32_1 = arith.constant 0 : i32
    return %c0_i32, %c0_i32_0 : i32, i32
  }
  func.func @transform_2(%arg0: i32) -> (i32, i32) {
    %c0_i32 = arith.constant 0 : i32
    %c0_i32_0 = arith.constant 0 : i32
    %c0_i32_1 = arith.constant 0 : i32
    return %c0_i32, %c0_i32_0 : i32, i32
  }
  func.func @transform_3(%arg0: i32) -> (i32, i32) {
    %c0_i32 = arith.constant 0 : i32
    %c0_i32_0 = arith.constant 0 : i32
    return %arg0, %c0_i32 : i32, i32
  }
}

module attributes {stable_mosaic.version = 11 : i64} {
  func.func @_linear_kernel(%arg0: i32, %arg1: memref<16x32xf32, #tpu.memory_space<vmem>>, %arg2: memref<32x96xbf16, #tpu.memory_space<vmem>>, %arg3: memref<1x96xf32, #tpu.memory_space<vmem>>, %arg4: memref<16x96xbf16, #tpu.memory_space<vmem>>) attributes {dimension_semantics = [#tpu.dimension_semantics<parallel>], iteration_bounds = array<i64: 1>, scalar_prefetch = 0 : i64, scratch_operands = 0 : i64, tpu.core_type = #tpu.core_type<tc>, window_params = [{transform_indices = @transform_0, window_bounds = array<i64: 16, 32>}, {pipeline_mode = #tpu.pipeline_mode<synchronous>, transform_indices = @transform_1, window_bounds = array<i64: 32, 96>}, {pipeline_mode = #tpu.pipeline_mode<synchronous>, transform_indices = @transform_2, window_bounds = array<i64: 1, 96>}, {transform_indices = @transform_3, window_bounds = array<i64: 16, 96>}]} {
    %c0 = arith.constant 0 : index
    %c0_0 = arith.constant 0 : index
    %0 = vector.load %arg1[%c0, %c0_0] : memref<16x32xf32, #tpu.memory_space<vmem>>, vector<16x32xf32>
    %1 = arith.truncf %0 : vector<16x32xf32> to vector<16x32xbf16>
    %c0_1 = arith.constant 0 : index
    %c0_2 = arith.constant 0 : index
    %2 = vector.load %arg2[%c0_1, %c0_2] : memref<32x96xbf16, #tpu.memory_space<vmem>>, vector<32x96xbf16>
    %cst = arith.constant dense<0.000000e+00> : vector<16x96xf32>
    %3 = tpu.matmul %1, %2, %cst {dimension_numbers = #tpu.dot_dimension_numbers<[1], [0], [0], [1], [0, 0, 1, 1], [], []>} : vector<16x32xbf16>, vector<32x96xbf16>, vector<16x96xf32> -> vector<16x96xf32>
    %c0_3 = arith.constant 0 : index
    %c0_4 = arith.constant 0 : index
    %4 = vector.load %arg3[%c0_3, %c0_4] : memref<1x96xf32, #tpu.memory_space<vmem>>, vector<1x96xf32>
    %5 = vector.broadcast %4 : vector<1x96xf32> to vector<16x96xf32>
    %6 = arith.addf %3, %5 : vector<16x96xf32>
    %7 = arith.truncf %6 : vector<16x96xf32> to vector<16x96xbf16>
    %c0_5 = arith.constant 0 : index
    %c0_6 = arith.constant 0 : index
    %8 = vector.load %arg4[%c0_5, %c0_6] : memref<16x96xbf16, #tpu.memory_space<vmem>>, vector<16x96xbf16>
    tpu.vector_store %arg4[%c0_5, %c0_6], %7 {strides = array<i32>} : memref<16x96xbf16, #tpu.memory_space<vmem>>, vector<16x96xbf16>,
    return
  }
  func.func @transform_0(%arg0: i32) -> (i32, i32) {
    %c0_i32 = arith.constant 0 : i32
    %c0_i32_0 = arith.constant 0 : i32
    return %arg0, %c0_i32 : i32, i32
  }
  func.func @transform_1(%arg0: i32) -> (i32, i32) {
    %c0_i32 = arith.constant 0 : i32
    %c0_i32_0 = arith.constant 0 : i32
    %c0_i32_1 = arith.constant 0 : i32
    return %c0_i32, %c0_i32_0 : i32, i32
  }
  func.func @transform_2(%arg0: i32) -> (i32, i32) {
    %c0_i32 = arith.constant 0 : i32
    %c0_i32_0 = arith.constant 0 : i32
    %c0_i32_1 = arith.constant 0 : i32
    return %c0_i32, %c0_i32_0 : i32, i32
  }
  func.func @transform_3(%arg0: i32) -> (i32, i32) {
    %c0_i32 = arith.constant 0 : i32
    %c0_i32_0 = arith.constant 0 : i32
    return %arg0, %c0_i32 : i32, i32
  }
}

module attributes {stable_mosaic.version = 11 : i64} {
  func.func @_linear_kernel(%arg0: i32, %arg1: memref<16x32xf32, #tpu.memory_space<vmem>>, %arg2: memref<32x96xbf16, #tpu.memory_space<vmem>>, %arg3: memref<1x96xf32, #tpu.memory_space<vmem>>, %arg4: memref<16x96xf32, #tpu.memory_space<vmem>>) attributes {dimension_semantics = [#tpu.dimension_semantics<parallel>], iteration_bounds = array<i64: 1>, scalar_prefetch = 0 : i64, scratch_operands = 0 : i64, tpu.core_type = #tpu.core_type<tc>, window_params = [{transform_indices = @transform_0, window_bounds = array<i64: 16, 32>}, {pipeline_mode = #tpu.pipeline_mode<synchronous>, transform_indices = @transform_1, window_bounds = array<i64: 32, 96>}, {pipeline_mode = #tpu.pipeline_mode<synchronous>, transform_indices = @transform_2, window_bounds = array<i64: 1, 96>}, {transform_indices = @transform_3, window_bounds = array<i64: 16, 96>}]} {
    %c0 = arith.constant 0 : index
    %c0_0 = arith.constant 0 : index
    %0 = vector.load %arg1[%c0, %c0_0] : memref<16x32xf32, #tpu.memory_space<vmem>>, vector<16x32xf32>
    %1 = arith.truncf %0 : vector<16x32xf32> to vector<16x32xbf16>
    %c0_1 = arith.constant 0 : index
    %c0_2 = arith.constant 0 : index
    %2 = vector.load %arg2[%c0_1, %c0_2] : memref<32x96xbf16, #tpu.memory_space<vmem>>, vector<32x96xbf16>
    %cst = arith.constant dense<0.000000e+00> : vector<16x96xf32>
    %3 = tpu.matmul %1, %2, %cst {dimension_numbers = #tpu.dot_dimension_numbers<[1], [0], [0], [1], [0, 0, 1, 1], [], []>} : vector<16x32xbf16>, vector<32x96xbf16>, vector<16x96xf32> -> vector<16x96xf32>
    %c0_3 = arith.constant 0 : index
    %c0_4 = arith.constant 0 : index
    %4 = vector.load %arg3[%c0_3, %c0_4] : memref<1x96xf32, #tpu.memory_space<vmem>>, vector<1x96xf32>
    %5 = vector.broadcast %4 : vector<1x96xf32> to vector<16x96xf32>
    %6 = arith.addf %3, %5 : vector<16x96xf32>
    %c0_5 = arith.constant 0 : index
    %c0_6 = arith.constant 0 : index
    %7 = vector.load %arg4[%c0_5, %c0_6] : memref<16x96xf32, #tpu.memory_space<vmem>>, vector<16x96xf32>
    tpu.vector_store %arg4[%c0_5, %c0_6], %6 {strides = array<i32>} : memref<16x96xf32, #tpu.memory_space<vmem>>, vector<16x96xf32>,
    return
  }
  func.func @transform_0(%arg0: i32) -> (i32, i32) {
    %c0_i32 = arith.constant 0 : i32
    %c0_i32_0 = arith.constant 0 : i32
    return %arg0, %c0_i32 : i32, i32
  }
  func.func @transform_1(%arg0: i32) -> (i32, i32) {
    %c0_i32 = arith.constant 0 : i32
    %c0_i32_0 = arith.constant 0 : i32
    %c0_i32_1 = arith.constant 0 : i32
    return %c0_i32, %c0_i32_0 : i32, i32
  }
  func.func @transform_2(%arg0: i32) -> (i32, i32) {
    %c0_i32 = arith.constant 0 : i32
    %c0_i32_0 = arith.constant 0 : i32
    %c0_i32_1 = arith.constant 0 : i32
    return %c0_i32, %c0_i32_0 : i32, i32
  }
  func.func @transform_3(%arg0: i32) -> (i32, i32) {
    %c0_i32 = arith.constant 0 : i32
    %c0_i32_0 = arith.constant 0 : i32
    return %arg0, %c0_i32 : i32, i32
  }
}

module attributes {stable_mosaic.version = 11 : i64} {
  func.func @_dec_recurrence_kernel(%arg0: memref<7x2x96xf32, #tpu.memory_space<vmem>>, %arg1: memref<2x8x32xbf16, #tpu.memory_space<vmem>>, %arg2: memref<2x8x96xbf16, #tpu.memory_space<vmem>>, %arg3: memref<2x1x8xf32, #tpu.memory_space<vmem>>, %arg4: memref<2x32xf32, #tpu.memory_space<vmem>>, %arg5: memref<32x96xbf16, #tpu.memory_space<vmem>>, %arg6: memref<1x96xf32, #tpu.memory_space<vmem>>, %arg7: memref<7x2x32xf32, #tpu.memory_space<vmem>>, %arg8: memref<2x32xf32, #tpu.memory_space<vmem>>) attributes {dimension_semantics = [], scalar_prefetch = 0 : i64, scratch_operands = 1 : i64, tpu.core_type = #tpu.core_type<tc>} {
    %c0 = arith.constant 0 : index
    %c0_0 = arith.constant 0 : index
    %0 = vector.load %arg4[%c0, %c0_0] : memref<2x32xf32, #tpu.memory_space<vmem>>, vector<2x32xf32>
    %c0_1 = arith.constant 0 : index
    %c0_2 = arith.constant 0 : index
    %1 = vector.load %arg8[%c0_1, %c0_2] : memref<2x32xf32, #tpu.memory_space<vmem>>, vector<2x32xf32>
    tpu.vector_store %arg8[%c0_1, %c0_2], %0 {strides = array<i32>} : memref<2x32xf32, #tpu.memory_space<vmem>>, vector<2x32xf32>,
    %c0_i32 = arith.constant 0 : i32
    %c7_i32 = arith.constant 7 : i32
    %2 = arith.addi %c0_i32, %c7_i32 : i32
    %c1_i32 = arith.constant 1 : i32
    scf.for %arg9 = %c0_i32 to %2 step %c1_i32  : i32 {
      %c0_4 = arith.constant 0 : index
      %c0_5 = arith.constant 0 : index
      %3 = vector.load %arg8[%c0_4, %c0_5] : memref<2x32xf32, #tpu.memory_space<vmem>>, vector<2x32xf32>
      %4 = arith.truncf %3 : vector<2x32xf32> to vector<2x32xbf16>
      %5 = vector.shape_cast %4 : vector<2x32xbf16> to vector<2x1x32xbf16>
      %c0_6 = arith.constant 0 : index
      %c0_7 = arith.constant 0 : index
      %c0_8 = arith.constant 0 : index
      %6 = vector.load %arg1[%c0_6, %c0_7, %c0_8] : memref<2x8x32xbf16, #tpu.memory_space<vmem>>, vector<2x8x32xbf16>
      "tpu.trace_start"() <{level = 10 : i32, message = "bqh,bsh->bqs"}> : () -> ()
      %cst = arith.constant dense<0.000000e+00> : vector<2x1x8xf32>
      %7 = tpu.matmul %5, %6, %cst {dimension_numbers = #tpu.dot_dimension_numbers<[2], [2], [1], [1], [0, 0, 0, 1, 1, 1], [0], [0]>} : vector<2x1x32xbf16>, vector<2x8x32xbf16>, vector<2x1x8xf32> -> vector<2x1x8xf32>
      "tpu.trace_stop"() : () -> ()
      %c0_9 = arith.constant 0 : index
      %c0_10 = arith.constant 0 : index
      %c0_11 = arith.constant 0 : index
      %8 = vector.load %arg3[%c0_9, %c0_10, %c0_11] : memref<2x1x8xf32, #tpu.memory_space<vmem>>, vector<2x1x8xf32>
      %9 = arith.addf %7, %8 : vector<2x1x8xf32>
      %cst_12 = arith.constant dense<0xFF800000> : vector<2x1xf32>
      %10 = vector.multi_reduction <maximumf>, %9, %cst_12 [2] : vector<2x1x8xf32> to vector<2x1xf32>
      %11 = vector.shape_cast %10 : vector<2x1xf32> to vector<2x1x1xf32>
      %12 = vector.broadcast %11 : vector<2x1x1xf32> to vector<2x1x8xf32>
      %13 = arith.subf %9, %12 : vector<2x1x8xf32>
      %14 = math.exp %13 : vector<2x1x8xf32>
      %cst_13 = arith.constant dense<0.000000e+00> : vector<2x1xf32>
      %15 = vector.multi_reduction <add>, %14, %cst_13 [2] : vector<2x1x8xf32> to vector<2x1xf32>
      %16 = vector.shape_cast %15 : vector<2x1xf32> to vector<2x1x1xf32>
      %17 = tpu.reciprocal %16 {approx = true} : vector<2x1x1xf32> -> vector<2x1x1xf32>
      %18 = vector.broadcast %17 : vector<2x1x1xf32> to vector<2x1x8xf32>
      %19 = arith.mulf %14, %18 : vector<2x1x8xf32>
      %20 = arith.truncf %19 : vector<2x1x8xf32> to vector<2x1x8xbf16>
      %21 = arith.index_cast %arg9 : i32 to index
      %c0_14 = arith.constant 0 : index
      %c0_15 = arith.constant 0 : index
      %22 = vector.load %arg0[%21, %c0_14, %c0_15] : memref<7x2x96xf32, #tpu.memory_space<vmem>>, vector<1x2x96xf32>
      %23 = vector.shape_cast %22 : vector<1x2x96xf32> to vector<2x96xf32>
      %c0_16 = arith.constant 0 : index
      %c0_17 = arith.constant 0 : index
      %c0_18 = arith.constant 0 : index
      %24 = vector.load %arg2[%c0_16, %c0_17, %c0_18] : memref<2x8x96xbf16, #tpu.memory_space<vmem>>, vector<2x8x96xbf16>
      "tpu.trace_start"() <{level = 10 : i32, message = "bqs,bsg->bqg"}> : () -> ()
      %cst_19 = arith.constant dense<0.000000e+00> : vector<2x1x96xf32>
      %25 = tpu.matmul %20, %24, %cst_19 {dimension_numbers = #tpu.dot_dimension_numbers<[2], [1], [1], [2], [0, 0, 0, 1, 1, 2], [0], [0]>} : vector<2x1x8xbf16>, vector<2x8x96xbf16>, vector<2x1x96xf32> -> vector<2x1x96xf32>
      "tpu.trace_stop"() : () -> ()
      %26 = vector.shape_cast %25 : vector<2x1x96xf32> to vector<2x96xf32>
      %27 = arith.addf %23, %26 : vector<2x96xf32>
      %c0_20 = arith.constant 0 : index
      %c0_21 = arith.constant 0 : index
      %28 = vector.load %arg5[%c0_20, %c0_21] : memref<32x96xbf16, #tpu.memory_space<vmem>>, vector<32x96xbf16>
      %cst_22 = arith.constant dense<0.000000e+00> : vector<2x96xf32>
      %29 = tpu.matmul %4, %28, %cst_22 {dimension_numbers = #tpu.dot_dimension_numbers<[1], [0], [0], [1], [0, 0, 1, 1], [], []>} : vector<2x32xbf16>, vector<32x96xbf16>, vector<2x96xf32> -> vector<2x96xf32>
      %c0_23 = arith.constant 0 : index
      %c0_24 = arith.constant 0 : index
      %30 = vector.load %arg6[%c0_23, %c0_24] : memref<1x96xf32, #tpu.memory_space<vmem>>, vector<1x96xf32>
      %31 = vector.broadcast %30 : vector<1x96xf32> to vector<2x96xf32>
      %32 = arith.addf %29, %31 : vector<2x96xf32>
      %33 = vector.extract_strided_slice %27 {offsets = [0, 0], sizes = [2, 32], strides = [1, 1]} : vector<2x96xf32> to vector<2x32xf32>
      %34 = vector.extract_strided_slice %32 {offsets = [0, 0], sizes = [2, 32], strides = [1, 1]} : vector<2x96xf32> to vector<2x32xf32>
      %35 = arith.addf %33, %34 : vector<2x32xf32>
      %36 = arith.negf %35 : vector<2x32xf32>
      %37 = math.exp %36 : vector<2x32xf32>
      %cst_25 = arith.constant 1.000000e+00 : f32
      %38 = vector.broadcast %cst_25 : f32 to vector<2x32xf32>
      %39 = arith.addf %38, %37 : vector<2x32xf32>
      %40 = arith.divf %38, %39 : vector<2x32xf32>
      %41 = vector.extract_strided_slice %27 {offsets = [0, 32], sizes = [2, 32], strides = [1, 1]} : vector<2x96xf32> to vector<2x32xf32>
      %42 = vector.extract_strided_slice %32 {offsets = [0, 32], sizes = [2, 32], strides = [1, 1]} : vector<2x96xf32> to vector<2x32xf32>
      %43 = arith.addf %41, %42 : vector<2x32xf32>
      %44 = arith.negf %43 : vector<2x32xf32>
      %45 = math.exp %44 : vector<2x32xf32>
      %cst_26 = arith.constant 1.000000e+00 : f32
      %46 = vector.broadcast %cst_26 : f32 to vector<2x32xf32>
      %47 = arith.addf %46, %45 : vector<2x32xf32>
      %48 = arith.divf %46, %47 : vector<2x32xf32>
      %49 = vector.extract_strided_slice %27 {offsets = [0, 64], sizes = [2, 32], strides = [1, 1]} : vector<2x96xf32> to vector<2x32xf32>
      %50 = vector.extract_strided_slice %32 {offsets = [0, 64], sizes = [2, 32], strides = [1, 1]} : vector<2x96xf32> to vector<2x32xf32>
      %51 = arith.mulf %40, %50 : vector<2x32xf32>
      %52 = arith.addf %49, %51 : vector<2x32xf32>
      %53 = math.tanh %52 : vector<2x32xf32>
      %cst_27 = arith.constant 1.000000e+00 : f32
      %54 = vector.broadcast %cst_27 : f32 to vector<2x32xf32>
      %55 = arith.subf %54, %48 : vector<2x32xf32>
      %56 = arith.mulf %55, %53 : vector<2x32xf32>
      %57 = arith.mulf %48, %3 : vector<2x32xf32>
      %58 = arith.addf %56, %57 : vector<2x32xf32>
      %c0_28 = arith.constant 0 : index
      %c0_29 = arith.constant 0 : index
      %59 = vector.load %arg8[%c0_28, %c0_29] : memref<2x32xf32, #tpu.memory_space<vmem>>, vector<2x32xf32>
      tpu.vector_store %arg8[%c0_28, %c0_29], %58 {strides = array<i32>} : memref<2x32xf32, #tpu.memory_space<vmem>>, vector<2x32xf32>,
      %60 = arith.index_cast %arg9 : i32 to index
      %c0_30 = arith.constant 0 : index
      %c0_31 = arith.constant 0 : index
      %61 = vector.load %arg7[%60, %c0_30, %c0_31] : memref<7x2x32xf32, #tpu.memory_space<vmem>>, vector<1x2x32xf32>
      %62 = vector.shape_cast %61 : vector<1x2x32xf32> to vector<2x32xf32>
      %63 = vector.shape_cast %58 : vector<2x32xf32> to vector<1x2x32xf32>
      tpu.vector_store %arg7[%60, %c0_30, %c0_31], %63 {strides = array<i32>} : memref<7x2x32xf32, #tpu.memory_space<vmem>>, vector<1x2x32xf32>,
    }
    %c7_i32_3 = arith.constant 7 : i32
    return
  }
}

module attributes {stable_mosaic.version = 11 : i64} {
  func.func @_ce_kernel(%arg0: i32, %arg1: i32, %arg2: memref<16x32xbf16, #tpu.memory_space<vmem>>, %arg3: memref<16x1xi32, #tpu.memory_space<vmem>>, %arg4: memref<32x64xbf16, #tpu.memory_space<vmem>>, %arg5: memref<1x64xf32, #tpu.memory_space<vmem>>, %arg6: memref<16x1xf32, #tpu.memory_space<vmem>>, %arg7: memref<16x1xf32, #tpu.memory_space<vmem>>, %arg8: memref<16x1xf32, #tpu.memory_space<vmem>>, %arg9: memref<16x1xf32, #tpu.memory_space<vmem>>) attributes {dimension_semantics = [#tpu.dimension_semantics<parallel>, #tpu.dimension_semantics<arbitrary>], iteration_bounds = array<i64: 1, 1>, scalar_prefetch = 0 : i64, scratch_operands = 3 : i64, tpu.core_type = #tpu.core_type<tc>, window_params = [{transform_indices = @transform_0, window_bounds = array<i64: 16, 32>}, {transform_indices = @transform_1, window_bounds = array<i64: 16, 1>}, {transform_indices = @transform_2, window_bounds = array<i64: 32, 64>}, {transform_indices = @transform_3, window_bounds = array<i64: 1, 64>}, {transform_indices = @transform_4, window_bounds = array<i64: 16, 1>}]} {
    %c0_i32 = arith.constant 0 : i32
    %0 = arith.cmpi eq, %arg1, %c0_i32 : i32
    %1 = arith.extui %0 : i1 to i32
    %c0_i32_0 = arith.constant 0 : i32
    %2 = arith.cmpi ne, %1, %c0_i32_0 : i32
    scf.if %2 {
      %cst_27 = arith.constant 0xFF800000 : f32
      %44 = vector.broadcast %cst_27 : f32 to vector<16x1xf32>
      %c0_28 = arith.constant 0 : index
      %c0_29 = arith.constant 0 : index
      %45 = vector.load %arg7[%c0_28, %c0_29] : memref<16x1xf32, #tpu.memory_space<vmem>>, vector<16x1xf32>
      tpu.vector_store %arg7[%c0_28, %c0_29], %44 {strides = array<i32>} : memref<16x1xf32, #tpu.memory_space<vmem>>, vector<16x1xf32>,
      %cst_30 = arith.constant 0.000000e+00 : f32
      %46 = vector.broadcast %cst_30 : f32 to vector<16x1xf32>
      %c0_31 = arith.constant 0 : index
      %c0_32 = arith.constant 0 : index
      %47 = vector.load %arg8[%c0_31, %c0_32] : memref<16x1xf32, #tpu.memory_space<vmem>>, vector<16x1xf32>
      tpu.vector_store %arg8[%c0_31, %c0_32], %46 {strides = array<i32>} : memref<16x1xf32, #tpu.memory_space<vmem>>, vector<16x1xf32>,
      %cst_33 = arith.constant 0.000000e+00 : f32
      %48 = vector.broadcast %cst_33 : f32 to vector<16x1xf32>
      %c0_34 = arith.constant 0 : index
      %c0_35 = arith.constant 0 : index
      %49 = vector.load %arg9[%c0_34, %c0_35] : memref<16x1xf32, #tpu.memory_space<vmem>>, vector<16x1xf32>
      tpu.vector_store %arg9[%c0_34, %c0_35], %48 {strides = array<i32>} : memref<16x1xf32, #tpu.memory_space<vmem>>, vector<16x1xf32>,
    } else {
    }
    %c0 = arith.constant 0 : index
    %c0_1 = arith.constant 0 : index
    %3 = vector.load %arg2[%c0, %c0_1] : memref<16x32xbf16, #tpu.memory_space<vmem>>, vector<16x32xbf16>
    %c0_2 = arith.constant 0 : index
    %c0_3 = arith.constant 0 : index
    %4 = vector.load %arg4[%c0_2, %c0_3] : memref<32x64xbf16, #tpu.memory_space<vmem>>, vector<32x64xbf16>
    %cst = arith.constant dense<0.000000e+00> : vector<16x64xf32>
    %5 = tpu.matmul %3, %4, %cst {dimension_numbers = #tpu.dot_dimension_numbers<[1], [0], [0], [1], [0, 0, 1, 1], [], []>} : vector<16x32xbf16>, vector<32x64xbf16>, vector<16x64xf32> -> vector<16x64xf32>
    %c0_4 = arith.constant 0 : index
    %c0_5 = arith.constant 0 : index
    %6 = vector.load %arg5[%c0_4, %c0_5] : memref<1x64xf32, #tpu.memory_space<vmem>>, vector<1x64xf32>
    %7 = vector.broadcast %6 : vector<1x64xf32> to vector<16x64xf32>
    %8 = arith.addf %5, %7 : vector<16x64xf32>
    %cst_6 = arith.constant 1.250000e+00 : f32
    %9 = vector.broadcast %cst_6 : f32 to vector<16x64xf32>
    %10 = arith.mulf %8, %9 : vector<16x64xf32>
    %c0_7 = arith.constant 0 : index
    %c0_8 = arith.constant 0 : index
    %11 = vector.load %arg3[%c0_7, %c0_8] : memref<16x1xi32, #tpu.memory_space<vmem>>, vector<16x1xi32>
    %c64_i32 = arith.constant 64 : i32
    %12 = arith.muli %arg1, %c64_i32 : i32
    %13 = tpu.iota {dimensions = array<i32: 1>} : vector<16x64xi32>
    %14 = vector.broadcast %12 : i32 to vector<16x64xi32>
    %15 = arith.addi %14, %13 : vector<16x64xi32>
    %c0_9 = arith.constant 0 : index
    %c0_10 = arith.constant 0 : index
    %16 = vector.load %arg9[%c0_9, %c0_10] : memref<16x1xf32, #tpu.memory_space<vmem>>, vector<16x1xf32>
    %17 = vector.broadcast %11 : vector<16x1xi32> to vector<16x64xi32>
    %18 = arith.cmpi eq, %15, %17 : vector<16x64xi32>
    %cst_11 = arith.constant 0.000000e+00 : f32
    %19 = vector.broadcast %cst_11 : f32 to vector<16x64xf32>
    %20 = arith.select %18, %10, %19 : vector<16x64xi1>, vector<16x64xf32>
    %cst_12 = arith.constant dense<0.000000e+00> : vector<16xf32>
    %21 = vector.multi_reduction <add>, %20, %cst_12 [1] : vector<16x64xf32> to vector<16xf32>
    %22 = vector.shape_cast %21 : vector<16xf32> to vector<16x1xf32>
    %23 = arith.addf %16, %22 : vector<16x1xf32>
    %c0_13 = arith.constant 0 : index
    %c0_14 = arith.constant 0 : index
    %24 = vector.load %arg9[%c0_13, %c0_14] : memref<16x1xf32, #tpu.memory_space<vmem>>, vector<16x1xf32>
    tpu.vector_store %arg9[%c0_13, %c0_14], %23 {strides = array<i32>} : memref<16x1xf32, #tpu.memory_space<vmem>>, vector<16x1xf32>,
    %c0_15 = arith.constant 0 : index
    %c0_16 = arith.constant 0 : index
    %25 = vector.load %arg7[%c0_15, %c0_16] : memref<16x1xf32, #tpu.memory_space<vmem>>, vector<16x1xf32>
    %cst_17 = arith.constant dense<0xFF800000> : vector<16xf32>
    %26 = vector.multi_reduction <maximumf>, %10, %cst_17 [1] : vector<16x64xf32> to vector<16xf32>
    %27 = vector.shape_cast %26 : vector<16xf32> to vector<16x1xf32>
    %28 = arith.maximumf %25, %27 : vector<16x1xf32>
    %c0_18 = arith.constant 0 : index
    %c0_19 = arith.constant 0 : index
    %29 = vector.load %arg8[%c0_18, %c0_19] : memref<16x1xf32, #tpu.memory_space<vmem>>, vector<16x1xf32>
    %30 = arith.subf %25, %28 : vector<16x1xf32>
    %31 = math.exp %30 : vector<16x1xf32>
    %32 = arith.mulf %29, %31 : vector<16x1xf32>
    %33 = vector.broadcast %28 : vector<16x1xf32> to vector<16x64xf32>
    %34 = arith.subf %10, %33 : vector<16x64xf32>
    %35 = math.exp %34 : vector<16x64xf32>
    %cst_20 = arith.constant dense<0.000000e+00> : vector<16xf32>
    %36 = vector.multi_reduction <add>, %35, %cst_20 [1] : vector<16x64xf32> to vector<16xf32>
    %37 = vector.shape_cast %36 : vector<16xf32> to vector<16x1xf32>
    %38 = arith.addf %32, %37 : vector<16x1xf32>
    %c0_21 = arith.constant 0 : index
    %c0_22 = arith.constant 0 : index
    %39 = vector.load %arg8[%c0_21, %c0_22] : memref<16x1xf32, #tpu.memory_space<vmem>>, vector<16x1xf32>
    tpu.vector_store %arg8[%c0_21, %c0_22], %38 {strides = array<i32>} : memref<16x1xf32, #tpu.memory_space<vmem>>, vector<16x1xf32>,
    %c0_23 = arith.constant 0 : index
    %c0_24 = arith.constant 0 : index
    %40 = vector.load %arg7[%c0_23, %c0_24] : memref<16x1xf32, #tpu.memory_space<vmem>>, vector<16x1xf32>
    tpu.vector_store %arg7[%c0_23, %c0_24], %28 {strides = array<i32>} : memref<16x1xf32, #tpu.memory_space<vmem>>, vector<16x1xf32>,
    %c0_i32_25 = arith.constant 0 : i32
    %41 = arith.cmpi eq, %arg1, %c0_i32_25 : i32
    %42 = arith.extui %41 : i1 to i32
    %c0_i32_26 = arith.constant 0 : i32
    %43 = arith.cmpi ne, %42, %c0_i32_26 : i32
    scf.if %43 {
      %c-100_i32 = arith.constant -100 : i32
      %44 = vector.broadcast %c-100_i32 : i32 to vector<16x1xi32>
      %45 = arith.cmpi ne, %11, %44 : vector<16x1xi32>
      %46 = arith.extui %45 : vector<16x1xi1> to vector<16x1xi32>
      %47 = arith.sitofp %46 : vector<16x1xi32> to vector<16x1xf32>
      %c0_27 = arith.constant 0 : index
      %c0_28 = arith.constant 0 : index
      %48 = vector.load %arg7[%c0_27, %c0_28] : memref<16x1xf32, #tpu.memory_space<vmem>>, vector<16x1xf32>
      %c0_29 = arith.constant 0 : index
      %c0_30 = arith.constant 0 : index
      %49 = vector.load %arg8[%c0_29, %c0_30] : memref<16x1xf32, #tpu.memory_space<vmem>>, vector<16x1xf32>
      %50 = math.log %49 : vector<16x1xf32>
      %51 = arith.addf %48, %50 : vector<16x1xf32>
      %c0_31 = arith.constant 0 : index
      %c0_32 = arith.constant 0 : index
      %52 = vector.load %arg9[%c0_31, %c0_32] : memref<16x1xf32, #tpu.memory_space<vmem>>, vector<16x1xf32>
      %53 = arith.subf %51, %52 : vector<16x1xf32>
      %54 = arith.mulf %53, %47 : vector<16x1xf32>
      %c0_33 = arith.constant 0 : index
      %c0_34 = arith.constant 0 : index
      %55 = vector.load %arg6[%c0_33, %c0_34] : memref<16x1xf32, #tpu.memory_space<vmem>>, vector<16x1xf32>
      tpu.vector_store %arg6[%c0_33, %c0_34], %54 {strides = array<i32>} : memref<16x1xf32, #tpu.memory_space<vmem>>, vector<16x1xf32>,
    } else {
    }
    return
  }
  func.func @transform_0(%arg0: i32, %arg1: i32) -> (i32, i32) {
    %c0_i32 = arith.constant 0 : i32
    %c0_i32_0 = arith.constant 0 : i32
    return %arg0, %c0_i32 : i32, i32
  }
  func.func @transform_1(%arg0: i32, %arg1: i32) -> (i32, i32) {
    %c0_i32 = arith.constant 0 : i32
    %c0_i32_0 = arith.constant 0 : i32
    return %arg0, %c0_i32 : i32, i32
  }
  func.func @transform_2(%arg0: i32, %arg1: i32) -> (i32, i32) {
    %c0_i32 = arith.constant 0 : i32
    %c0_i32_0 = arith.constant 0 : i32
    return %c0_i32, %arg1 : i32, i32
  }
  func.func @transform_3(%arg0: i32, %arg1: i32) -> (i32, i32) {
    %c0_i32 = arith.constant 0 : i32
    %c0_i32_0 = arith.constant 0 : i32
    return %c0_i32, %arg1 : i32, i32
  }
  func.func @transform_4(%arg0: i32, %arg1: i32) -> (i32, i32) {
    %c0_i32 = arith.constant 0 : i32
    %c0_i32_0 = arith.constant 0 : i32
    return %arg0, %c0_i32 : i32, i32
  }
}

</mosaic_0001>

<bundles_post_ra>
// kernel: rnn_enc_dec_forward.7
= control target key start
LH: loop header
LB: loop body
LE: loop exit
PB: predicated region body
PF: predicated region fallthrough
CT: control target
= control target key end

     0   :  { %v122_v1 = vmov 0   ;;  %vm54_vm0 = vcmask 261120   ;;  %v24_v8 = vlaneseq  ;;  %vm102_vm1 = vcmask 523264   ;;  %s176_s1 = inlined_call_operand.vmem [shape: bf16[32,192], index: 1, kind: input, shape index: {}]   ;;  %s177_s0 = inlined_call_operand.vmem [shape: f32[16,32], index: 0, kind: input, shape index: {}]   ;;  %s178_s2 = inlined_call_operand.vmem [shape: f32[1,192], index: 2, kind: input, shape index: {}]   ;;  %s179_s3 = inlined_call_operand.vmem [shape: f32[16,192], index: 3, kind: output, shape index: {}]  }
   0x1   :  { %v116_v0 = vld [vmem:[%s176_s1 + $0x14] ss:$8 sps:$4 sm:$0xff]   ;;  %90 = vmatprep.mubr.bf16.mxu0 %v122_v1  ;;  %v118_v2 = vld [vmem:[%s176_s1 + $0x10] ss:$8 sps:$4 sm:$0xff]   ;;  %v119_v3 = vld [vmem:[%s176_s1 + $0x4] ss:$8 sps:$4 sm:$0xff]  }
   0x2   :  { %70 = vmatprep.subr.bf16.mxu0 %v116_v0  ;;  %v121_v4 = vld [vmem:[%s176_s1] ss:$8 sps:$4 sm:$0xff]   ;;  %v25_v9 = vshrl.u32 %v24_v8, 7 }
   0x3   :  { %71 = vmatpush1.bf16.msra.mxu0 %v118_v2  ;;  %v15_v5 = vld [vmem:[%s177_s0] sm:$0xff]  ;;  %v16_v6 = vld [vmem:[%s177_s0 + $0x8] sm:$0xff] }
   0x4   :  { %72 = vmatprep.subr.bf16.mxu0 %v119_v3  ;;  %v17_v7 = vpack.c.bf16 %v16_v6, %v15_v5  ;;  %v26_v10 = vsub.s32 0, %v25_v9  ;;  %v22_v11 = vld [vmem:[%s178_s2] sm:$0x3]  ;;  %v30_v12 = vsub.s32 1, %v25_v9 }
   0x6   :  { %v27_v13 = vrot.slane %v22_v11, %v26_v10  ;;  %v31_v14 = vrot.slane %v22_v11, %v30_v12 }
   0x7   :  { %73 = vmatpush1.bf16.msra.mxu0 %v121_v4 }
   0xa   :  { %114 = vmatmul.mubr.msk.bf16.vlgmr.msra.gmra.mxu0 %vm54_vm0, %v17_v7 }
  0xca   :  { %v92_v15 = vpop.f32.mrf.mxu0 }
  0xcb   :  { %v93_v16 = vadd.f32 %v92_v15, %v27_v13 }
  0xcc   :  { %v94_v17 = vpop.f32.mrf.mxu0 }
  0xcd   :  { %101 = vst [vmem:[%s179_s3] sm:$0xff] %v93_v16  ;;  %v95_v18 = vadd.f32 %v94_v17, %v31_v14 }
  0xce   :  { %v96_v19 = vpop.f32.mrf.mxu0 }
  0xcf   :  { %103 = vst.msk [vmem:[%s179_s3 + $0x8] sm:$0xff] %vm102_vm1, %v95_v18  ;;  %v97_v20 = vadd.f32 %v96_v19, %v27_v13 }
  0xd0   :  { %v98_v21 = vpop.f32.mrf.mxu0 }
  0xd1   :  { %104 = vst [vmem:[%s179_s3 + $0x10] sm:$0xff] %v97_v20  ;;  %v99_v22 = vadd.f32 %v98_v21, %v31_v14 }
  0xd3   :  { %105 = vst.msk [vmem:[%s179_s3 + $0x18] sm:$0xff] %vm102_vm1, %v99_v22 }

// kernel: rnn_enc_dec_forward.8
= control target key start
LH: loop header
LB: loop body
LE: loop exit
PB: predicated region body
PF: predicated region fallthrough
CT: control target
= control target key end

     0   :  { %s837_s18 = smov 0   ;;  %s839_s19 = smov 0   ;;  %s939_s0 = inlined_call_operand.vmem [shape: f32[2,8,2,96], index: 0, kind: input, shape index: {}]   ;;  %s940_s1 = inlined_call_operand.vmem [shape: s32[2,1], index: 1, kind: input, shape index: {}]   ;;  %s941_s2 = inlined_call_operand.vmem [shape: bf16[2,32,96], index: 2, kind: input, shape index: {}]   ;;  %s942_s3 = inlined_call_operand.vmem [shape: f32[2,1,96], index: 3, kind: input, shape index: {}]   ;;  %s943_s4 = inlined_call_operand.vmem [shape: f32[2,8,2,32], index: 4, kind: output, shape index: {0}]   ;;  %s944_s5 = inlined_call_operand.vmem [shape: f32[2,2,32], index: 5, kind: output, shape index: {1}]  }
   0x1   :  { %s841_s20 = smov 0  }
   0x2 LB: > { %s28_s21 = sadd.s32 1, %s790_s19  ;;  %p687_p0 = scmp.ge.s32.totalorder %s794_s20, 1  ;;  %s794_s20 = sphi %s841_s20, %s16_s20   ;;  %s790_s19 = sphi %s839_s19, %s946_s19   ;;  %s786_s18 = sphi %s837_s18, %s945_s18  }
   0x3   : > { %p30_p1 = scmp.ge.s32.totalorder %s28_s21, 2  ;;  %p253_p2 = scmp.lt.s32.totalorder %s794_s20, 3 }
   0x5   : > { %s948_s21 = smov (%p30_p1, %s28_s21), 0  ;;  %p254_p3 = pnand %p687_p0, %p253_p2 }
   0x6   : > { %p314_p4 = scmp.lt.s32.totalorder (!%p254_p3), %s786_s18, 1  ;;  %s891_s17 = smov (!%p254_p3), 0  }
   0x7   : > { %257 = sbr.rel (%p254_p3) target bundleno = 717 (0x2cd), region = 36 }
   0xc   : > { %vm362_vm0 = vcmask 254976   ;;  %v861_v0 = vld [vmem:[%s940_s1] sm:$0x3]  ;;  %v800_v1 = vmov 0.0   ;;  %s315_s24 = scalar_select %p314_p4, %s786_s18, 1 }
   0xd   : > { %363 = vst.msk [vmem:[#allocation2] sm:$0x3] %vm362_vm0, %v800_v1 }
   0xe   : > { %s865_s25 = sshll.u32 %s315_s24, 4  ;;  %s334_s28 = scalar_lea.vmem %s942_s3, %s315_s24 }
   0xf   : > { %s321_s6 = scalar_lea.vmem %s939_s0, %s865_s25  ;;  %s878_s9 = scalar_lea.vmem %s941_s2, %s865_s25  ;;  %v880_v2 = vld [vmem:[%s334_s28] ss:$0 sm:$0xff] }
  0x10   : > { %s347_s12 = scalar_lea.vmem %s943_s4, %s865_s25  ;;  %s694_s13 = sshll.u32 %s315_s24, 1 }
  0x11   : > { %s889_s16 = scalar_lea.vmem %s944_s5, %s694_s13 }
  0x12 LB: >> { %v760_v3 = vld [vmem:[%s878_s9 + $0x8] sm:$0xff]   ;;  %v801_v4 = vmov 0.0   ;;  %v761_v5 = vld [vmem:[%s878_s9] sm:$0xff]   ;;  %vm802_vm1 = vmmov 0   ;;  %s695_s22 = sshll.u32 %s798_s17, 1  ;;  %v803_v7 = vmov 0   ;;  %s798_s17 = sphi %s891_s17, %s376_s17  }
  0x13   : >> { %711 = vmatprep.subr.bf16.mxu0 %v801_v4  ;;  %715 = vmatprep.mubr.msk.bf16.mxu0 %vm802_vm1, %v801_v4  ;;  %s378_s23 = ssub.s32 7, %s695_s22  ;;  %vm409_vm2 = vcmask 261120   ;;  %s804_s27 = smov 32  }
  0x14   : >> { %712 = vmatpush3.bf16.msra.mxu0 %v760_v3  ;;  %v385_v6 = vld [vmem:[#allocation2] sm:$0x3]  ;;  %758 = vset.pattern.permute.xlu1 %v803_v7  ;;  %s379_s24 = smul.u32 %s786_s18, %s378_s23  ;;  %s805_s28 = smov 64  }
  0x15   : >> { %713 = vmatprep.subr.bf16.mxu0 %v801_v4  ;;  %759 = vset.pattern.permute.xlu0 %v803_v7  ;;  %v386_v8 = vpack.c.bf16 %v385_v6, %v385_v6  ;;  %s806_s10 = smov 96  }
  0x16   : >> { %s901_s26 = sadd.s32 %s798_s17, %s379_s24  ;;  %s376_s17 = sadd.s32 1, %s798_s17  }
  0x17   : >> { %v483_v9 = vstv %s901_s26  ;;  %s696_s29 = sshll.u32 %s901_s26, 1  ;;  %p373_p5 = scmp.ge.s32.totalorder %s376_s17, 8  }
  0x18   : >> { %714 = vmatpush3.bf16.msra.mxu0 %v761_v5  ;;  %vm484_vm3 = vcmp.lt.s32.totalorder %v483_v9, %v861_v0  ;;  %s383_s8 = scalar_lea.vmem %s321_s6, %s696_s29  ;;  %s516_s14 = scalar_lea.vmem %s347_s12, %s696_s29 }
  0x19   : >> { %v702_v10 = vsel %vm484_vm3, 1.0, %v801_v4  ;;  %v384_v17 = vld [vmem:[%s383_s8] sm:$0x3] }
  0x1a   : >> { %v493_v11 = vsub.f32 1.0, %v702_v10 }
  0x1b   : >> { %716 = vmatmul.mubr.msk.bf16.vlgmr.msra.gmra.mxu0 %vm409_vm2, %v386_v8 }
  0x1c   : >> { %496 = vperm.xlu1 %758, %v493_v11  }
  0x20   : >> { %489 = vperm.xlu1 %758, %v702_v10  }
  0x24   : >> { %478 = vrot.lane.b32.xlu1 %v385_v6, %s804_s27 }
  0x97   : >> { %v497_v28 = vpop.permute.xlu1 %496 }
  0x98   : >> { %v499_v29 = vmul.f32 %v497_v28, %v385_v6 }
  0x9b   : >> { %v490_v30 = vpop.permute.xlu1 %489 }
  0x9f   : >> { %v479_v31 = vpop.permute.xlu1 %478 }
  0xdb   : >> { %v447_v12 = vpop.f32.mrf.mxu0 }
  0xdc   : >> { %v448_v13 = vadd.f32 %v880_v2, %v447_v12 }
  0xdd   : >> { %v717_v14 = vpop.f32.mrf.mxu0 }
  0xde   : >> { %461 = vrot.lane.b32.xlu0 %v448_v13, %s805_s28  ;;  %v453_v18 = vadd.f32 %v448_v13, %v384_v17 }
  0xdf   : >> { %v450_v15 = vpop.f32.mrf.mxu0 }
  0xe0   : >> { %v701_v19 = vmul.f32 -1.442695, %v453_v18 }
  0xe1   : >> { %v718_v16 = vpop.f32.mrf.mxu0 }
  0xe2   : >> { %762 = vpow2.f32 %v701_v19 }
  0xef   : >> { %v763_v20 = vpop.eup %762 }
  0xf0   : >> { %v457_v21 = vadd.f32 1.0, %v763_v20 }
  0xf2   : >> { %764 = vrcp.f32 %v457_v21 }
  0xff   : >> { %v765_v22 = vpop.eup %764 }
 0x100   : >> { %v471_v32 = vsub.f32 1.0, %v765_v22  ;;  %v481_v34 = vmul.f32 %v765_v22, %v479_v31 }
 0x150   : >> { %v462_v23 = vpop.permute.xlu0 %461 }
 0x151   : >> { %v464_v24 = vmul.f32 %v765_v22, %v462_v23 }
 0x153   : >> { %466 = vrot.lane.b32.xlu0 %v464_v24, %s805_s28 }
 0x1c5   : >> { %v467_v25 = vpop.permute.xlu0 %466 }
 0x1c6   : >> { %v469_v26 = vadd.f32 %v467_v25, %v384_v17 }
 0x1c8   : >> { %766 = vtanh.f32 %v469_v26 }
 0x1d5   : >> { %v767_v27 = vpop.eup %766 }
 0x1d6   : >> { %473 = vrot.lane.b32.xlu0 %v767_v27, %s806_s10 }
 0x1da   : >> { %501 = vrot.lane.b32.xlu0 %v499_v29, %s804_s27 }
 0x248   : >> { %v474_v33 = vpop.permute.xlu0 %473 }
 0x249   : >> { %v476_v35 = vmul.f32 %v474_v33, %v471_v32 }
 0x24b   : >> { %v482_v36 = vadd.f32 %v481_v34, %v476_v35 }
 0x24c   : >> { %v502_v37 = vpop.permute.xlu0 %501 }
 0x24d   : >> { %v492_v38 = vmul.f32 %v490_v30, %v482_v36 }
 0x24f   : >> { %v504_v39 = vadd.f32 %v502_v37, %v492_v38 }
 0x251   : >> { %v511_v40 = vmul.f32 %v504_v39, %v490_v30  ;;  %506 = vrot.lane.b32.xlu1 %v504_v39, %s806_s10 }
 0x253   : >> { %513 = vrot.lane.b32.xlu0 %v511_v40, %s806_s10 }
 0x2c2   : > { %375 = sbr.rel (!%p373_p5) target bundleno = 18 (0x12), region = 97 }
 0x2c3   : >> { %v507_v41 = vpop.permute.xlu1 %506 }
 0x2c4   : >> { %510 = vst.msk [vmem:[#allocation2] sm:$0x3] %vm362_vm0, %v507_v41 }
 0x2c5   : >> { %v514_v42 = vpop.permute.xlu0 %513 }
 0x2c6   : >> { %517 = vst.msk [vmem:[%s516_s14] sm:$0x3] %vm362_vm0, %v514_v42 }
 0x2cb   : > { %v518_v43 = vld [vmem:[#allocation2] sm:$0x3] }
 0x2cc   : > { %520 = vst.msk [vmem:[%s889_s16] sm:$0x3] %vm362_vm0, %v518_v43 }
 0x2cd PF: > { %s16_s20 = sadd.s32 1, %s794_s20   ;;  %s945_s18 = smov %s790_s19 }
 0x2ce   : > { %p13_p6 = scmp.ge.s32.totalorder %s16_s20, 4   ;;  %s946_s19 = smov %s948_s21 }
 0x2d0   :  { %15 = sbr.rel (!%p13_p6) target bundleno = 2 (0x2), region = 108 }

// kernel: rnn_enc_dec_forward.9
= control target key start
LH: loop header
LB: loop body
LE: loop exit
PB: predicated region body
PF: predicated region fallthrough
CT: control target
= control target key end

     0   :  { %vm59_vm0 = vcmask 523264   ;;  %vm117_vm1 = vcmask 261120   ;;  %s213_s1 = inlined_call_operand.vmem [shape: bf16[64,32], index: 1, kind: input, shape index: {}]   ;;  %s214_s0 = inlined_call_operand.vmem [shape: f32[24,64], index: 0, kind: input, shape index: {}]   ;;  %s215_s2 = inlined_call_operand.vmem [shape: f32[1,32], index: 2, kind: input, shape index: {}]   ;;  %s216_s3 = inlined_call_operand.vmem [shape: f32[24,32], index: 3, kind: output, shape index: {}]  }
   0x1   :  { %v150_v0 = vld [vmem:[%s213_s1 + $0x18] sm:$0xff]   ;;  %v151_v1 = vld [vmem:[%s213_s1 + $0x10] sm:$0xff]   ;;  %v152_v2 = vld [vmem:[%s213_s1 + $0x8] sm:$0xff]  }
   0x2   :  { %138 = vmatprep.subr.bf16.mxu0 %v150_v0  ;;  %v15_v3 = vld [vmem:[%s214_s0] sm:$0xff]  ;;  %v16_v4 = vld [vmem:[%s214_s0 + $0x8] sm:$0xff]  ;;  %v17_v7 = vld [vmem:[%s214_s0 + $0x10] sm:$0xff] }
   0x3   :  { %139 = vmatpush3.bf16.msra.mxu0 %v150_v0  ;;  %v18_v5 = vpack.c.bf16 %v16_v4, %v15_v3  ;;  %v153_v6 = vld [vmem:[%s213_s1] sm:$0xff]   ;;  %v19_v8 = vpack.c.bf16 %v17_v7, %v17_v7 }
   0x4   :  { %140 = vmatprep.subr.bf16.mxu0 %v151_v1  ;;  %v125_v9 = vld [vmem:[%s215_s2] ss:$0 sm:$0xff] }
   0x5   :  { %146 = vmatprep.mubr.msk.bf16.mxu0 %vm59_vm0, %v18_v5 }
   0x7   :  { %141 = vmatpush3.bf16.msra.mxu0 %v151_v1 }
   0x8   :  { %142 = vmatprep.subr.bf16.mxu0 %v152_v2 }
   0xb   :  { %143 = vmatpush3.bf16.msra.mxu0 %v152_v2 }
   0xc   :  { %144 = vmatprep.subr.bf16.mxu0 %v153_v6 }
   0xf   :  { %145 = vmatpush3.bf16.msra.mxu0 %v153_v6 }
  0x12   :  { %147 = vmatmul.mubr.msk.bf16.vlgmr.msra.gmra.mxu0 %vm59_vm0, %v19_v8 }
  0xd2   :  { %v148_v10 = vpop.f32.mrf.mxu0 }
  0xd3   :  { %v109_v11 = vadd.f32 %v148_v10, %v125_v9 }
  0xd4   :  { %v100_v12 = vpop.f32.mrf.mxu0 }
  0xd5   :  { %154 = vtanh.f32 %v109_v11  ;;  %v101_v13 = vadd.f32 %v125_v9, %v100_v12 }
  0xd6   :  { %v149_v14 = vpop.f32.mrf.mxu0 }
  0xd7   :  { %156 = vtanh.f32 %v101_v13 }
  0xd8   :  { %v103_v15 = vpop.f32.mrf.mxu0 }
  0xd9   :  { %v104_v16 = vadd.f32 %v125_v9, %v103_v15 }
  0xdb   :  { %158 = vtanh.f32 %v104_v16 }
  0xe2   :  { %v155_v17 = vpop.eup %154 }
  0xe3   :  { %120 = vst.msk [vmem:[%s216_s3 + $0x10] sm:$0xff] %vm117_vm1, %v155_v17 }
  0xe4   :  { %v157_v18 = vpop.eup %156 }
  0xe5   :  { %118 = vst.msk [vmem:[%s216_s3] sm:$0xff] %vm117_vm1, %v157_v18 }
  0xe8   :  { %v159_v19 = vpop.eup %158 }
  0xe9   :  { %119 = vst.msk [vmem:[%s216_s3 + $0x8] sm:$0xff] %vm117_vm1, %v159_v19 }

// kernel: rnn_enc_dec_forward.10
= control target key start
LH: loop header
LB: loop body
LE: loop exit
PB: predicated region body
PF: predicated region fallthrough
CT: control target
= control target key end

     0   :  { %v124_v0 = vmov 0.0   ;;  %vm125_vm0 = vmmov 0   ;;  %vm41_vm1 = vcmask 261120   ;;  %vm94_vm2 = vcmask 781312   ;;  %s167_s1 = inlined_call_operand.vmem [shape: bf16[32,96], index: 1, kind: input, shape index: {}]   ;;  %s168_s0 = inlined_call_operand.vmem [shape: f32[16,32], index: 0, kind: input, shape index: {}]   ;;  %s169_s2 = inlined_call_operand.vmem [shape: f32[1,96], index: 2, kind: input, shape index: {}]   ;;  %s170_s3 = inlined_call_operand.vmem [shape: bf16[16,96], index: 3, kind: output, shape index: {}]  }
   0x1   :  { %112 = vmatprep.subr.bf16.mxu0 %v124_v0  ;;  %v122_v1 = vld [vmem:[%s167_s1 + $0x8] sm:$0xff]   ;;  %116 = vmatprep.mubr.msk.bf16.mxu0 %vm125_vm0, %v124_v0  ;;  %v123_v2 = vld [vmem:[%s167_s1] sm:$0xff]  }
   0x2   :  { %113 = vmatpush3.bf16.msra.mxu0 %v122_v1  ;;  %v15_v3 = vld [vmem:[%s168_s0] sm:$0xff]  ;;  %v16_v4 = vld [vmem:[%s168_s0 + $0x8] sm:$0xff] }
   0x3   :  { %114 = vmatprep.subr.bf16.mxu0 %v124_v0  ;;  %v17_v5 = vpack.c.bf16 %v16_v4, %v15_v3  ;;  %v101_v6 = vld [vmem:[%s169_s2] ss:$0 sm:$0xff] }
   0x6   :  { %115 = vmatpush3.bf16.msra.mxu0 %v123_v2 }
   0x9   :  { %117 = vmatmul.mubr.msk.bf16.vlgmr.msra.gmra.mxu0 %vm41_vm1, %v17_v5 }
  0xc9   :  { %v79_v7 = vpop.f32.mrf.mxu0 }
  0xca   :  { %v80_v8 = vadd.f32 %v101_v6, %v79_v7 }
  0xcb   :  { %v118_v9 = vpop.f32.mrf.mxu0 }
  0xcc   :  { %v107_v10 = vpack.c.bf16 %v80_v8, %v80_v8 }
  0xcd   :  { %v82_v11 = vpop.f32.mrf.mxu0 }
  0xce   :  { %95 = vst.msk [vmem:[%s170_s3] sm:$0xf] %vm94_vm2, %v107_v10  ;;  %v83_v12 = vadd.f32 %v101_v6, %v82_v11 }
  0xcf   :  { %v119_v13 = vpop.f32.mrf.mxu0 }
  0xd0   :  { %v108_v14 = vpack.c.bf16 %v83_v12, %v83_v12 }
  0xd2   :  { %96 = vst.msk [vmem:[%s170_s3 + $0x4] sm:$0xf] %vm94_vm2, %v108_v14 }

// kernel: rnn_enc_dec_forward.11
= control target key start
LH: loop header
LB: loop body
LE: loop exit
PB: predicated region body
PF: predicated region fallthrough
CT: control target
= control target key end

     0   :  { %v112_v0 = vmov 0.0   ;;  %vm113_vm0 = vmmov 0   ;;  %vm41_vm1 = vcmask 261120   ;;  %vm86_vm2 = vcmask 785408   ;;  %s155_s1 = inlined_call_operand.vmem [shape: bf16[32,96], index: 1, kind: input, shape index: {}]   ;;  %s156_s0 = inlined_call_operand.vmem [shape: f32[16,32], index: 0, kind: input, shape index: {}]   ;;  %s157_s2 = inlined_call_operand.vmem [shape: f32[1,96], index: 2, kind: input, shape index: {}]   ;;  %s158_s3 = inlined_call_operand.vmem [shape: f32[16,96], index: 3, kind: output, shape index: {}]  }
   0x1   :  { %100 = vmatprep.subr.bf16.mxu0 %v112_v0  ;;  %v110_v1 = vld [vmem:[%s155_s1 + $0x8] sm:$0xff]   ;;  %104 = vmatprep.mubr.msk.bf16.mxu0 %vm113_vm0, %v112_v0  ;;  %v111_v2 = vld [vmem:[%s155_s1] sm:$0xff]  }
   0x2   :  { %101 = vmatpush3.bf16.msra.mxu0 %v110_v1  ;;  %v15_v3 = vld [vmem:[%s156_s0] sm:$0xff]  ;;  %v16_v4 = vld [vmem:[%s156_s0 + $0x8] sm:$0xff] }
   0x3   :  { %102 = vmatprep.subr.bf16.mxu0 %v112_v0  ;;  %v17_v5 = vpack.c.bf16 %v16_v4, %v15_v3  ;;  %v93_v6 = vld [vmem:[%s157_s2] ss:$0 sm:$0xff] }
   0x6   :  { %103 = vmatpush3.bf16.msra.mxu0 %v111_v2 }
   0x9   :  { %105 = vmatmul.mubr.msk.bf16.vlgmr.msra.gmra.mxu0 %vm41_vm1, %v17_v5 }
  0xc9   :  { %v79_v7 = vpop.f32.mrf.mxu0 }
  0xca   :  { %v80_v8 = vadd.f32 %v93_v6, %v79_v7 }
  0xcb   :  { %v106_v9 = vpop.f32.mrf.mxu0 }
  0xcc   :  { %87 = vst.msk [vmem:[%s158_s3] sm:$0xff] %vm86_vm2, %v80_v8 }
  0xcd   :  { %v82_v10 = vpop.f32.mrf.mxu0 }
  0xce   :  { %v83_v11 = vadd.f32 %v93_v6, %v82_v10 }
  0xcf   :  { %v107_v12 = vpop.f32.mrf.mxu0 }
  0xd0   :  { %88 = vst.msk [vmem:[%s158_s3 + $0x8] sm:$0xff] %vm86_vm2, %v83_v11 }

// kernel: rnn_enc_dec_forward.12
= control target key start
LH: loop header
LB: loop body
LE: loop exit
PB: predicated region body
PF: predicated region fallthrough
CT: control target
= control target key end

     0   :  { %vm28_vm0 = vcmask 254976   ;;  %s551_s26 = smov 0   ;;  %s633_s0 = inlined_call_operand.vmem [shape: f32[7,2,96], index: 0, kind: input, shape index: {}]   ;;  %s634_s1 = inlined_call_operand.vmem [shape: bf16[2,8,32], index: 1, kind: input, shape index: {}]   ;;  %s635_s2 = inlined_call_operand.vmem [shape: bf16[2,8,96], index: 2, kind: input, shape index: {}]   ;;  %s636_s3 = inlined_call_operand.vmem [shape: f32[2,1,8], index: 3, kind: input, shape index: {}]   ;;  %s637_s4 = inlined_call_operand.vmem [shape: f32[2,32], index: 4, kind: input, shape index: {}]   ;;  %s638_s5 = inlined_call_operand.vmem [shape: bf16[32,96], index: 5, kind: input, shape index: {}]   ;;  %s639_s6 = inlined_call_operand.vmem [shape: f32[1,96], index: 6, kind: input, shape index: {}]   ;;  %s640_s7 = inlined_call_operand.vmem [shape: f32[7,2,32], index: 7, kind: output, shape index: {}]  }
   0x1   :  { %v27_v0 = vld [vmem:[%s637_s4] sm:$0x3] }
   0x2   :  { %29 = vst.msk [vmem:[#allocation2] sm:$0x3] %vm28_vm0, %v27_v0 }
   0x3 LB: > { %v55_v1 = vld [vmem:[%s634_s1] sm:$0xf]  ;;  %vm64_vm1 = vcmask 261120   ;;  %v56_v2 = vld [vmem:[%s634_s1 + $0x4] sm:$0xf]  ;;  %v42_v3 = vlaneseq  ;;  %v501_v4 = vmov 0.0   ;;  %s499_s26 = sphi %s551_s26, %s35_s26  }
   0x4   : > { %431 = vmatprep.subr.bf16.mxu0 %v501_v4  ;;  %v69_v5 = vsel %vm64_vm1, %v55_v1, 0  ;;  %437 = vmatprep.subr.bf16.mxu1 %v501_v4  ;;  %v120_v6 = vsel %vm64_vm1, %v56_v2, 0  ;;  %vm502_vm2 = vmmov 0   ;;  %v503_v9 = vmov 1966171168   ;;  %v477_v54 = vld [vmem:[%s638_s5 + $0x8] sm:$0xff]  }
   0x5   : > { %432 = vmatpush3.bf16.xpose.msra.mxu0 %v69_v5  ;;  %438 = vmatpush3.bf16.xpose.msra.mxu1 %v120_v6  ;;  %v43_v8 = vshrl.u32 %v42_v3, 7  ;;  %v40_v10 = vunpack.c.l.s4 %v503_v9  ;;  %v57_v22 = vld [vmem:[%s636_s3] sm:$0x1]  ;;  %vm162_vm3 = vcmask 57344   ;;  %v58_v24 = vld [vmem:[%s636_s3 + $0x1] sm:$0x1] }
   0x6   : > { %433 = vmatprep.mubr.msk.bf16.mxu0 %vm502_vm2, %v501_v4  ;;  %439 = vmatprep.mubr.msk.bf16.mxu1 %vm502_vm2, %v501_v4  ;;  %v190_v46 = vld [vmem:[%s635_s2] sm:$0xf]  ;;  %vm196_vm4 = vcmask 1043456   ;;  %v191_v48 = vld [vmem:[%s635_s2 + $0x4] sm:$0xf]  ;;  %vm192_vm5 = vcmask 64512  }
   0x7   : > { %443 = vmatprep.subr.bf16.mxu0 %v501_v4  ;;  %449 = vmatprep.subr.bf16.mxu1 %v501_v4  ;;  %v41_v12 = vunpack.c.0.s8 %v40_v10  ;;  %v62_v16 = vsub.s32 0, %v43_v8  ;;  %v198_v47 = vsel %vm196_vm4, %v190_v46, 0  ;;  %v244_v49 = vsel %vm196_vm4, %v191_v48, 0  ;;  %v478_v58 = vld [vmem:[%s638_s5] sm:$0xff]   ;;  %s504_s21 = smov 64   ;;  %s412_s22 = sshll.u32 %s499_s26, 1 }
   0x8   : > { %vm289_vm6 = vcmask 1041409   ;;  %v415_v3 = vld [vmem:[%s639_s6] ss:$0 sm:$0xff]  ;;  %s188_s25 = scalar_lea.vmem %s633_s0, %s412_s22  ;;  %s505_s27 = smov 96  }
   0x9   : > { %v566_v7 = vld [vmem:[#allocation2] sm:$0x3]  ;;  %v44_v13 = vsub.s32 %v41_v12, %v43_v8  ;;  %s506_s28 = smov 32   ;;  %s394_s4 = scalar_lea.vmem %s640_s7, %s412_s22 }
   0xa   : > { %v576_v11 = vpack.c.bf16 %v566_v7, %v566_v7  ;;  %s35_s26 = sadd.s32 1, %s499_s26  }
   0xb   : > { %p32_p0 = scmp.ge.s32.totalorder %s35_s26, 7  }
   0xc   : > { %v45_v14 = vrot.slane %v576_v11, %v44_v13 }
   0xe   : > { %v52_v15 = vrot.slane %v45_v14, %v44_v13  ;;  %v189_v13 = vld [vmem:[%s188_s25] sm:$0x3] }
  0x10   : > { %v409_v17 = vpack.i.b16 %v52_v15, %v52_v15  ;;  %v54_v18 = vunpack.i.h.s16 %v52_v15 }
  0x12   : > { %v63_v19 = vrot.slane %v409_v17, %v62_v16  ;;  %v111_v20 = vpack.i.b16 %v54_v18, %v54_v18 }
  0x14   : > { %434 = vmatmul.mubr.msk.bf16.vlgmr.msra.gmra.mxu0 %vm64_vm1, %v63_v19  ;;  %v115_v21 = vrot.slane %v111_v20, %v62_v16 }
  0x15   : > { %445 = vmatprep.mubr.msk.bf16.mxu0 %vm502_vm2, %v501_v4  ;;  %444 = vmatpush3.bf16.msra.mxu0 %v198_v47 }
  0x16   : > { %440 = vmatmul.mubr.msk.bf16.vlgmr.msra.gmra.mxu1 %vm64_vm1, %v115_v21  ;;  %455 = vmatprep.subr.bf16.mxu0 %v501_v4 }
  0x17   : > { %451 = vmatprep.mubr.msk.bf16.mxu1 %vm502_vm2, %v501_v4  ;;  %450 = vmatpush3.bf16.msra.mxu1 %v244_v49 }
  0xd4   : > { %v105_v23 = vpop.f32.mrf.mxu0 }
  0xd5   : > { %v106_v25 = vadd.f32 %v105_v23, %v57_v22 }
  0xd6   : > { %v435_v26 = vpop.f32.mrf.mxu0  ;;  %v156_v27 = vpop.f32.mrf.mxu1 }
  0xd7   : > { %v163_v28 = vsel %vm162_vm3, %v106_v25, -inf  ;;  %v157_v29 = vadd.f32 %v156_v27, %v58_v24 }
  0xd8   : > { %164 = vmax.xlane.f32.xlu0 %v163_v28  ;;  %v108_v30 = vpop.f32.mrf.mxu0  ;;  %v441_v31 = vpop.f32.mrf.mxu1 }
  0xd9   : > { %v166_v32 = vsel %vm162_vm3, %v157_v29, -inf }
  0xda   : > { %v436_v33 = vpop.f32.mrf.mxu0  ;;  %v159_v34 = vpop.f32.mrf.mxu1 }
  0xdc   : > { %167 = vmax.xlane.f32.xlu0 %v166_v32  ;;  %v442_v35 = vpop.f32.mrf.mxu1 }
 0x161   : > { %v165_v36 = vpop.xlane.xlu0 %164 }
 0x162   : > { %v169_v37 = vsub.f32 %v106_v25, %v165_v36 }
 0x164   : > { %v171_v38 = vmul.f32 1.442695, %v169_v37 }
 0x165   : > { %v168_v39 = vpop.xlane.xlu0 %167 }
 0x166   : > { %479 = vpow2.f32 %v171_v38  ;;  %v170_v40 = vsub.f32 %v157_v29, %v168_v39 }
 0x168   : > { %v173_v41 = vmul.f32 1.442695, %v170_v40 }
 0x16a   : > { %481 = vpow2.f32 %v173_v41 }
 0x173   : > { %v480_v42 = vpop.eup %479 }
 0x174   : > { %v175_v43 = vsel %vm162_vm3, %v480_v42, 0.0 }
 0x175   : > { %176 = vadd.xlane.f32.xlu1 %v175_v43 }
 0x177   : > { %v482_v44 = vpop.eup %481 }
 0x178   : > { %v178_v45 = vsel %vm162_vm3, %v482_v44, 0.0 }
 0x179   : > { %179 = vadd.xlane.f32.xlu1 %v178_v45 }
 0x1fe   : > { %v177_v50 = vpop.xlane.xlu1 %176 }
 0x1ff   : > { %483 = vrcp.f32 %v177_v50 }
 0x202   : > { %v180_v51 = vpop.xlane.xlu1 %179 }
 0x203   : > { %485 = vrcp.f32 %v180_v51 }
 0x20c   : > { %v484_v52 = vpop.eup %483 }
 0x20d   : > { %v183_v53 = vmul.f32 %v484_v52, %v480_v42 }
 0x20f   : > { %v185_v55 = vpack.c.bf16 %v183_v53, %v183_v53 }
 0x210   : > { %v486_v56 = vpop.eup %485 }
 0x211   : > { %446 = vmatmul.mubr.msk.bf16.vlgmr.msra.gmra.mxu0 %vm192_vm5, %v185_v55  ;;  %v184_v57 = vmul.f32 %v486_v56, %v482_v44 }
 0x212   : > { %456 = vmatpush3.bf16.msra.mxu0 %v477_v54  ;;  %459 = vmatprep.mubr.msk.bf16.mxu0 %vm502_vm2, %v501_v4 }
 0x213   : > { %457 = vmatprep.subr.bf16.mxu0 %v501_v4  ;;  %v186_v59 = vpack.c.bf16 %v184_v57, %v184_v57 }
 0x215   : > { %452 = vmatmul.mubr.msk.bf16.vlgmr.msra.gmra.mxu1 %vm192_vm5, %v186_v59 }
 0x216   : > { %458 = vmatpush3.bf16.msra.mxu0 %v478_v58 }
 0x219   : > { %460 = vmatmul.mubr.msk.bf16.vlgmr.msra.gmra.mxu0 %vm64_vm1, %v576_v11 }
 0x2d1   : > { %v234_v60 = vpop.f32.mrf.mxu0 }
 0x2d3   : > { %v447_v61 = vpop.f32.mrf.mxu0 }
 0x2d5   : > { %v237_v62 = vpop.f32.mrf.mxu0  ;;  %v280_v63 = vpop.f32.mrf.mxu1 }
 0x2d6   : > { %v288_v0 = vrot.slane %v280_v63, 7 }
 0x2d7   : > { %v448_v1 = vpop.f32.mrf.mxu0  ;;  %v453_v2 = vpop.f32.mrf.mxu1 }
 0x2d8   : > { %v290_v4 = vsel %vm289_vm6, %v288_v0, %v234_v60 }
 0x2d9   : > { %v283_v5 = vpop.f32.mrf.mxu1  ;;  %v353_v6 = vpop.f32.mrf.mxu0  ;;  %v292_v14 = vadd.f32 %v290_v4, %v189_v13 }
 0x2da   : > { %v354_v8 = vadd.f32 %v415_v3, %v353_v6 }
 0x2db   : > { %v454_v9 = vpop.f32.mrf.mxu1  ;;  %v461_v10 = vpop.f32.mrf.mxu0 }
 0x2dc   : > { %367 = vrot.lane.b32.xlu0 %v354_v8, %s504_s21  ;;  %v359_v15 = vadd.f32 %v354_v8, %v292_v14 }
 0x2dd   : > { %v356_v11 = vpop.f32.mrf.mxu0 }
 0x2de   : > { %v419_v16 = vmul.f32 -1.442695, %v359_v15 }
 0x2df   : > { %v462_v12 = vpop.f32.mrf.mxu0 }
 0x2e0   : > { %487 = vpow2.f32 %v419_v16 }
 0x2ed   : > { %v488_v17 = vpop.eup %487 }
 0x2ee   : > { %v363_v18 = vadd.f32 1.0, %v488_v17 }
 0x2f0   : > { %489 = vrcp.f32 %v363_v18 }
 0x2fd   : > { %v490_v19 = vpop.eup %489 }
 0x2fe   : > { %v377_v26 = vsub.f32 1.0, %v490_v19 }
 0x34e   : > { %v368_v20 = vpop.permute.xlu0 %367 }
 0x34f   : > { %v370_v21 = vmul.f32 %v490_v19, %v368_v20 }
 0x351   : > { %372 = vrot.lane.b32.xlu1 %v370_v21, %s504_s21 }
 0x3c3   : > { %v373_v22 = vpop.permute.xlu1 %372 }
 0x3c4   : > { %v375_v23 = vadd.f32 %v373_v22, %v292_v14 }
 0x3c6   : > { %491 = vtanh.f32 %v375_v23 }
 0x3d3   : > { %v492_v24 = vpop.eup %491 }
 0x3d4   : > { %379 = vrot.lane.b32.xlu1 %v492_v24, %s505_s27 }
 0x3d8   : > { %384 = vrot.lane.b32.xlu1 %v566_v7, %s506_s28 }
 0x446   : > { %v380_v25 = vpop.permute.xlu1 %379 }
 0x447   : > { %v382_v28 = vmul.f32 %v380_v25, %v377_v26 }
 0x44a   : > { %v385_v27 = vpop.permute.xlu1 %384 }
 0x44b   : > { %v387_v29 = vmul.f32 %v490_v19, %v385_v27 }
 0x44d   : > { %v388_v30 = vadd.f32 %v387_v29, %v382_v28 }
 0x44f   : > { %390 = vrot.lane.b32.xlu0 %v388_v30, %s505_s27 }
 0x4be   :  { %34 = sbr.rel (!%p32_p0) target bundleno = 3 (0x3), region = 57 }
 0x4c1   : > { %v391_v31 = vpop.permute.xlu0 %390 }
 0x4c2   : > { %393 = vst.msk [vmem:[#allocation2] sm:$0x3] %vm28_vm0, %v391_v31  ;;  %395 = vst.msk [vmem:[%s394_s4] sm:$0x3] %vm28_vm0, %v391_v31 }

// kernel: rnn_enc_dec_forward.13
= control target key start
LH: loop header
LB: loop body
LE: loop exit
PB: predicated region body
PF: predicated region fallthrough
CT: control target
= control target key end

     0   :  { %v255_v0 = vmov 0.0   ;;  %vm256_vm0 = vmmov 0   ;;  %vm59_vm1 = vcmask 261120   ;;  %v257_v4 = vmov 0   ;;  %s345_s2 = inlined_call_operand.vmem [shape: bf16[32,64], index: 2, kind: input, shape index: {}]   ;;  %s346_s0 = inlined_call_operand.vmem [shape: bf16[16,32], index: 0, kind: input, shape index: {}]   ;;  %s347_s3 = inlined_call_operand.vmem [shape: f32[1,64], index: 3, kind: input, shape index: {}]   ;;  %s348_s1 = inlined_call_operand.vmem [shape: s32[16,1], index: 1, kind: input, shape index: {}]   ;;  %s349_s4 = inlined_call_operand.vmem [shape: f32[16,1], index: 4, kind: output, shape index: {}]  }
   0x1   :  { %226 = vmatprep.subr.bf16.mxu0 %v255_v0  ;;  %v240_v1 = vld [vmem:[%s345_s2 + $0x8] sm:$0xff]   ;;  %230 = vmatprep.mubr.msk.bf16.mxu0 %vm256_vm0, %v255_v0  ;;  %v241_v2 = vld [vmem:[%s345_s2] sm:$0xff]   ;;  %vm22_vm2 = vcmask 7168   ;;  %v258_v5 = vmov -inf   ;;  %vm125_vm3 = vcmask 523264   ;;  %v109_v25 = vlaneseq }
   0x2   :  { %227 = vmatpush3.bf16.msra.mxu0 %v240_v1  ;;  %v242_v3 = vld [vmem:[%s346_s0] sm:$0xff]   ;;  %239 = vset.pattern.permute.xlu0 %v257_v4  ;;  %23 = vst.msk [vmem:[#allocation2] sm:$0xff] %vm22_vm2, %v258_v5  ;;  %24 = vst.msk [vmem:[#allocation2 + $0x8] sm:$0xff] %vm22_vm2, %v258_v5  ;;  %v322_v27 = vld [vmem:[%s348_s1 + $0x8] sm:$0xff] }
   0x3   :  { %228 = vmatprep.subr.bf16.mxu0 %v255_v0  ;;  %238 = vset.pattern.permute.xlu1 %v257_v4  ;;  %25 = vst.msk [vmem:[#allocation3] sm:$0xff] %vm22_vm2, %v255_v0  ;;  %26 = vst.msk [vmem:[#allocation3 + $0x8] sm:$0xff] %vm22_vm2, %v255_v0  ;;  %v216_v6 = vld [vmem:[%s347_s3] ss:$0 sm:$0xff]  ;;  %v110_v28 = vand.u32 127, %v109_v25  ;;  %vm189_vm7 = vcmp.ne.s32.totalorder %v322_v27, 4294967196 }
   0x4   :  { %27 = vst.msk [vmem:[#allocation4] sm:$0xff] %vm22_vm2, %v255_v0  ;;  %28 = vst.msk [vmem:[#allocation4 + $0x8] sm:$0xff] %vm22_vm2, %v255_v0  ;;  %v314_v17 = vld [vmem:[%s348_s1] sm:$0xff] }
   0x5   :  { %vm188_vm6 = vcmp.ne.s32.totalorder %v314_v17, 4294967196 }
   0x6   :  { %229 = vmatpush3.bf16.msra.mxu0 %v241_v2 }
   0x9   :  { %231 = vmatmul.mubr.msk.bf16.vlgmr.msra.gmra.mxu0 %vm59_vm1, %v242_v3  ;;  %v137_v18 = vld [vmem:[#allocation2] sm:$0xff]  ;;  %v138_v21 = vld [vmem:[#allocation2 + $0x8] sm:$0xff] }
   0xa   :  { %v147_v51 = vld [vmem:[#allocation3] sm:$0xff]  ;;  %v148_v55 = vld [vmem:[#allocation3 + $0x8] sm:$0xff] }
   0xb   :  { %v113_v44 = vld [vmem:[#allocation4] sm:$0xff]  ;;  %v114_v60 = vld [vmem:[#allocation4 + $0x8] sm:$0xff] }
  0xc9   :  { %v97_v7 = vpop.f32.mrf.mxu0 }
  0xca   :  { %v98_v8 = vadd.f32 %v216_v6, %v97_v7  ;;  %v221_v7 = vsel %vm188_vm6, 1.0, %v255_v0 }
  0xcb   :  { %v232_v9 = vpop.f32.mrf.mxu0 }
  0xcc   :  { %v104_v10 = vmul.f32 1.25, %v98_v8 }
  0xcd   :  { %v100_v11 = vpop.f32.mrf.mxu0 }
  0xce   :  { %v101_v12 = vadd.f32 %v216_v6, %v100_v11  ;;  %v139_v13 = vsel %vm125_vm3, %v104_v10, -inf }
  0xcf   :  { %140 = vmax.xlane.f32.xlu0 %v139_v13  ;;  %v233_v14 = vpop.f32.mrf.mxu0 }
  0xd0   :  { %v105_v15 = vmul.f32 1.25, %v101_v12  ;;  %v222_v14 = vsel %vm189_vm7, 1.0, %v255_v0 }
  0xd2   :  { %v142_v16 = vsel %vm125_vm3, %v105_v15, -inf }
  0xd3   :  { %143 = vmax.xlane.f32.xlu0 %v142_v16 }
  0xe9   :  { %116 = vperm.xlu0 %239, %v314_v17  }
 0x158   :  { %v141_v19 = vpop.xlane.xlu0 %140 }
 0x159   :  { %v145_v20 = vmax.f32 %v137_v18, %v141_v19 }
 0x15b   :  { %v149_v22 = vsub.f32 %v137_v18, %v145_v20  ;;  %183 = vst.msk [vmem:[#allocation2] sm:$0xff] %vm22_vm2, %v145_v20  ;;  %159 = vperm.xlu1 %238, %v145_v20  }
 0x15c   :  { %v144_v23 = vpop.xlane.xlu0 %143 }
 0x15d   :  { %v146_v24 = vmax.f32 %v138_v21, %v144_v23  ;;  %v151_v48 = vmul.f32 1.442695, %v149_v22 }
 0x15f   :  { %v150_v26 = vsub.f32 %v138_v21, %v146_v24  ;;  %184 = vst.msk [vmem:[#allocation2 + $0x8] sm:$0xff] %vm22_vm2, %v146_v24  ;;  %164 = vperm.xlu1 %238, %v146_v24  }
 0x161   :  { %v153_v49 = vmul.f32 1.442695, %v150_v26 }
 0x162   :  { %v194_v4 = vld [vmem:[#allocation2] sm:$0xff] }
 0x163   :  { %119 = vperm.xlu1 %238, %v322_v27  }
 0x164   :  { %v117_v29 = vpop.permute.xlu0 %116 }
 0x165   :  { %vm121_vm4 = vcmp.eq.s32.totalorder %v110_v28, %v117_v29 }
 0x166   :  { %v123_v30 = vsel %vm121_vm4, %v104_v10, 0.0  ;;  %v195_v11 = vld [vmem:[#allocation2 + $0x8] sm:$0xff] }
 0x167   :  { %v126_v31 = vsel %vm125_vm3, %v123_v30, 0.0 }
 0x168   :  { %127 = vadd.xlane.f32.xlu0 %v126_v31 }
 0x1d6   :  { %v160_v32 = vpop.permute.xlu1 %159 }
 0x1d7   :  { %v167_v33 = vsub.f32 %v104_v10, %v160_v32 }
 0x1d9   :  { %v169_v34 = vmul.f32 1.442695, %v167_v33 }
 0x1da   :  { %v165_v35 = vpop.permute.xlu1 %164 }
 0x1db   :  { %243 = vpow2.f32 %v169_v34  ;;  %v168_v36 = vsub.f32 %v105_v15, %v165_v35 }
 0x1dd   :  { %v171_v37 = vmul.f32 1.442695, %v168_v36 }
 0x1de   :  { %v120_v39 = vpop.permute.xlu1 %119 }
 0x1df   :  { %245 = vpow2.f32 %v171_v37  ;;  %vm122_vm5 = vcmp.eq.s32.totalorder %v110_v28, %v120_v39 }
 0x1e0   :  { %v124_v43 = vsel %vm122_vm5, %v105_v15, 0.0  ;;  %247 = vpow2.f32 %v151_v48 }
 0x1e1   :  { %v129_v46 = vsel %vm125_vm3, %v124_v43, 0.0  ;;  %249 = vpow2.f32 %v153_v49 }
 0x1e8   :  { %v244_v38 = vpop.eup %243 }
 0x1e9   :  { %v173_v40 = vsel %vm125_vm3, %v244_v38, 0.0 }
 0x1ea   :  { %174 = vadd.xlane.f32.xlu1 %v173_v40 }
 0x1ec   :  { %v246_v41 = vpop.eup %245 }
 0x1ed   :  { %v176_v42 = vsel %vm125_vm3, %v246_v41, 0.0  ;;  %v248_v50 = vpop.eup %247 }
 0x1ee   :  { %177 = vadd.xlane.f32.xlu1 %v176_v42  ;;  %v155_v52 = vmul.f32 %v248_v50, %v147_v51  ;;  %v250_v53 = vpop.eup %249 }
 0x1ef   :  { %v156_v57 = vmul.f32 %v250_v53, %v148_v55 }
 0x1f1   :  { %v128_v45 = vpop.xlane.xlu0 %127 }
 0x1f2   :  { %v132_v47 = vadd.f32 %v128_v45, %v113_v44  ;;  %130 = vadd.xlane.f32.xlu1 %v129_v46 }
 0x1f4   :  { %135 = vst.msk [vmem:[#allocation4] sm:$0xff] %vm22_vm2, %v132_v47 }
 0x1fb   :  { %v204_v8 = vld [vmem:[#allocation4] sm:$0xff] }
 0x273   :  { %v175_v54 = vpop.xlane.xlu1 %174 }
 0x274   :  { %v179_v56 = vadd.f32 %v175_v54, %v155_v52 }
 0x276   :  { %181 = vst.msk [vmem:[#allocation3] sm:$0xff] %vm22_vm2, %v179_v56 }
 0x277   :  { %v178_v58 = vpop.xlane.xlu1 %177 }
 0x278   :  { %v180_v59 = vadd.f32 %v178_v58, %v156_v57 }
 0x27a   :  { %182 = vst.msk [vmem:[#allocation3 + $0x8] sm:$0xff] %vm22_vm2, %v180_v59 }
 0x27b   :  { %v131_v61 = vpop.xlane.xlu1 %130 }
 0x27c   :  { %v133_v62 = vadd.f32 %v131_v61, %v114_v60 }
 0x27d   :  { %v196_v63 = vld [vmem:[#allocation3] sm:$0xff] }
 0x27e   :  { %251 = vlog2.f32 %v196_v63  ;;  %136 = vst.msk [vmem:[#allocation4 + $0x8] sm:$0xff] %vm22_vm2, %v133_v62 }
 0x281   :  { %v197_v1 = vld [vmem:[#allocation3 + $0x8] sm:$0xff] }
 0x282   :  { %253 = vlog2.f32 %v197_v1 }
 0x285   :  { %v205_v15 = vld [vmem:[#allocation4 + $0x8] sm:$0xff] }
 0x28b   :  { %v252_v2 = vpop.eup %251 }
 0x28c   :  { %v199_v3 = vmul.f32 0.6931472, %v252_v2 }
 0x28e   :  { %v202_v5 = vadd.f32 %v199_v3, %v194_v4 }
 0x28f   :  { %v254_v6 = vpop.eup %253 }
 0x290   :  { %v206_v9 = vsub.f32 %v202_v5, %v204_v8  ;;  %v201_v10 = vmul.f32 0.6931472, %v254_v6 }
 0x292   :  { %v208_v12 = vmul.f32 %v221_v7, %v206_v9  ;;  %v203_v13 = vadd.f32 %v201_v10, %v195_v11 }
 0x294   :  { %v207_v16 = vsub.f32 %v203_v13, %v205_v15  ;;  %210 = vst.msk [vmem:[%s349_s4] sm:$0xff] %vm22_vm2, %v208_v12 }
 0x296   :  { %v209_v17 = vmul.f32 %v222_v14, %v207_v16 }
 0x298   :  { %211 = vst.msk [vmem:[%s349_s4 + $0x8] sm:$0xff] %vm22_vm2, %v209_v17 }

</bundles_post_ra>
